<compile_context>
chip_gen: v6e
topology: v6e:2x2x1
jax: 0.10.0
libtpu: 0.0.40
codegen_flags: <defaults>
</compile_context>

<pallas_src>
import functools

import numpy as np
import jax
import jax.numpy as jnp
from jax.experimental import pallas as pl
from jax.experimental.pallas import tpu as pltpu

NEG_SLOPE = 0.01            # nn.LeakyReLU default
BN_EPS = 1e-5               # nn.BatchNorm2d default
MXU_DTYPE = jnp.bfloat16    # matmul operand dtype (accumulation is always f32)
LANE = 128

KERNELS = [8, 4, 3]
STRIDES = [4, 2, 1]
CHANNELS_OUT = [32, 64, 64]
HIDDEN = 512


def conv2d_size_out(size, kernel_size, stride):
    return (size - (kernel_size - 1) - 1) // stride + 1


def _round_up(x, m):
    return ((x + m - 1) // m) * m


def _geometry(in_dim):
    C, H, W = in_dim[-3], in_dim[-2], in_dim[-1]
    hs, ws, cs = [H], [W], [C] + CHANNELS_OUT
    for k, s in zip(KERNELS, STRIDES):
        hs.append(conv2d_size_out(hs[-1], k, s))
        ws.append(conv2d_size_out(ws[-1], k, s))
    return C, hs, ws, cs


# ---------------------------------------------------------------------------
# Pallas kernel (whole network, one call; one grid step per batch element)
# ---------------------------------------------------------------------------
def _conv_block(act, sel, wmat, shift, m_out, n_k):
    """Conv+BN+LeakyReLU on a [M_in, Cin] activation.

    The im2col gather is done on the MXU: x = sel @ act, where sel is a constant
    0/1 matrix of shape [n_k*m_out, M_in]; the n_k row-blocks are then laid side
    by side along lanes to form the [m_out, n_k*Cin] patch matrix.
    """
    x = jnp.dot(sel, act.astype(MXU_DTYPE), preferred_element_type=jnp.float32)
    parts = [x[k * m_out:(k + 1) * m_out, :] for k in range(n_k)]
    p = parts[0] if n_k == 1 else jnp.concatenate(parts, axis=1)
    y = jnp.dot(p.astype(MXU_DTYPE), wmat, preferred_element_type=jnp.float32) + shift
    return jnp.where(y >= 0.0, y, NEG_SLOPE * y)


def _make_kernel(m1, m2, m3, k2sq, k3sq):
    def kernel(p1_ref, w1_ref, sh1_ref,
               sel2_ref, w2_ref, sh2_ref,
               sel3_ref, w3_ref, sh3_ref,
               wf1_ref, bf1_ref, wf2_ref, bf2_ref, o_ref):
        # ---- conv1 (+BN+LeakyReLU): patches [m1, k1*k1*C] prepared outside (one XLA op)
        y1 = jnp.dot(p1_ref[0], w1_ref[...],
                     preferred_element_type=jnp.float32) + sh1_ref[...]
        a1 = jnp.where(y1 >= 0.0, y1, NEG_SLOPE * y1)                      # [m1, 32] f32

        # ---- conv2 / conv3 (+BN+LeakyReLU), im2col via MXU selection matmuls
        a2 = _conv_block(a1, sel2_ref[...], w2_ref[...], sh2_ref[...], m2, k2sq)  # [m2, 64]
        a3 = _conv_block(a2, sel3_ref[...], w3_ref[...], sh3_ref[...], m3, k3sq)  # [m3, 64]

        # ---- flatten (row-major (spatial, channel); fc1 rows were permuted to match)
        if m3 == 1:
            feat = a3
        else:
            feat = jnp.concatenate([a3[i:i + 1, :] for i in range(m3)], axis=1)

        # ---- fc1 -> tanh -> fc2 (output lane-padded to a multiple of 128)
        h = jnp.tanh(jnp.dot(feat.astype(MXU_DTYPE), wf1_ref[...],
                             preferred_element_type=jnp.float32) + bf1_ref[...])
        out = jnp.dot(h.astype(MXU_DTYPE), wf2_ref[...],
                      preferred_element_type=jnp.float32) + bf2_ref[...]
        o_ref[0] = out
    return kernel


# ---------------------------------------------------------------------------
# Host-side: parameter init (PyTorch layout) and one-time packing
# ---------------------------------------------------------------------------
def init_params(key, in_dim, out_dim):
    C, hs, ws, cs = _geometry(in_dim)
    params = {"convs": []}
    for i, (k, s) in enumerate(zip(KERNELS, STRIDES)):
        cin, cout = cs[i], cs[i + 1]
        key, k1, k2 = jax.random.split(key, 3)
        bound = 1.0 / float(cin * k * k) ** 0.5
        params["convs"].append(dict(
            w=jax.random.uniform(k1, (cout, cin, k, k), jnp.float32, -bound, bound),
            b=jax.random.uniform(k2, (cout,), jnp.float32, -bound, bound),
            gamma=jnp.ones((cout,), jnp.float32),
            beta=jnp.zeros((cout,), jnp.float32),
            mean=jnp.zeros((cout,), jnp.float32),
            var=jnp.ones((cout,), jnp.float32),
        ))
    lin_in = hs[-1] * ws[-1] * cs[-1]
    key, k1, k2, k3, k4 = jax.random.split(key, 5)
    b1 = 1.0 / float(lin_in) ** 0.5
    b2 = 1.0 / float(HIDDEN) ** 0.5
    params["w1"] = jax.random.uniform(k1, (HIDDEN, lin_in), jnp.float32, -b1, b1)  # (out, in)
    params["b1"] = jax.random.uniform(k2, (HIDDEN,), jnp.float32, -b1, b1)
    params["w2"] = jax.random.uniform(k3, (out_dim, HIDDEN), jnp.float32, -b2, b2)
    params["b2"] = jax.random.uniform(k4, (out_dim,), jnp.float32, -b2, b2)
    return params


def _make_selection(ih, iw, k, s):
    """0/1 matrix S[(di*k+dj)*OH*OW + oh*OW+ow, (s*oh+di)*iw + (s*ow+dj)] = 1."""
    oh, ow = conv2d_size_out(ih, k, s), conv2d_size_out(iw, k, s)
    m = oh * ow
    sel = np.zeros((k * k * m, ih * iw), np.float32)
    for di in range(k):
        for dj in range(k):
            for r in range(oh):
                for c in range(ow):
                    sel[(di * k + dj) * m + r * ow + c, (s * r + di) * iw + (s * c + dj)] = 1.0
    return sel


def pack_params(params, in_dim, out_dim):
    """One-time packing: BN-folded, (kh,kw,cin)-major matmul weights + gather matrices."""
    C, hs, ws, cs = _geometry(in_dim)
    packed = {}

    def fold_conv(layer):
        cout = layer["w"].shape[0]
        inv = 1.0 / np.sqrt(np.asarray(layer["var"], np.float32) + BN_EPS)
        scale = np.asarray(layer["gamma"], np.float32) * inv
        shift = np.asarray(layer["beta"], np.float32) + \
            (np.asarray(layer["b"], np.float32) - np.asarray(layer["mean"], np.float32)) * scale
        # torch (OC, Cin, KH, KW) -> (KH, KW, Cin, OC) -> (KH*KW*Cin, OC); fold BN scale in
        wmat = np.asarray(layer["w"], np.float32).transpose(2, 3, 1, 0).reshape(-1, cout)
        wmat = wmat * scale[None, :]
        return jnp.asarray(wmat, MXU_DTYPE), jnp.asarray(shift.reshape(1, cout), jnp.float32)

    packed["w1"], packed["sh1"] = fold_conv(params["convs"][0])
    packed["w2"], packed["sh2"] = fold_conv(params["convs"][1])
    packed["w3"], packed["sh3"] = fold_conv(params["convs"][2])

    # conv1 im2col as ONE XLA gather-conv: 0/1 kernel mapping (c, di, dj) ->
    # output feature f = (di*K + dj)*C + c  (same order as the weight flatten above).
    k1 = KERNELS[0]
    eye = np.zeros((k1 * k1 * C, C, k1, k1), np.float32)
    for di in range(k1):
        for dj in range(k1):
            for c in range(C):
                eye[(di * k1 + dj) * C + c, c, di, dj] = 1.0
    packed["im2col_w"] = jnp.asarray(eye)

    # In-kernel im2col selection matrices for conv2 / conv3.
    packed["sel2"] = jnp.asarray(_make_selection(hs[1], ws[1], KERNELS[1], STRIDES[1]), MXU_DTYPE)
    packed["sel3"] = jnp.asarray(_make_selection(hs[2], ws[2], KERNELS[2], STRIDES[2]), MXU_DTYPE)

    # fc1: torch (HIDDEN, lin_in) with columns ordered (c, oh, ow) -> rows ordered (oh, ow, c)
    oh3, ow3, c3 = hs[3], ws[3], cs[3]
    lin_in = oh3 * ow3 * c3
    wf1 = np.asarray(params["w1"], np.float32).reshape(HIDDEN, c3, oh3, ow3)
    wf1 = wf1.transpose(2, 3, 1, 0).reshape(lin_in, HIDDEN)
    packed["wf1"] = jnp.asarray(wf1, MXU_DTYPE)
    packed["bf1"] = jnp.asarray(np.asarray(params["b1"], np.float32).reshape(1, HIDDEN))

    # fc2: pad the output (lane) dimension up to 128 -> unmasked full-lane store
    out_pad = _round_up(out_dim, LANE)
    wf2 = np.zeros((HIDDEN, out_pad), np.float32)
    wf2[:, :out_dim] = np.asarray(params["w2"], np.float32).T
    bf2 = np.zeros((1, out_pad), np.float32)
    bf2[0, :out_dim] = np.asarray(params["b2"], np.float32)
    packed["wf2"] = jnp.asarray(wf2, MXU_DTYPE)
    packed["bf2"] = jnp.asarray(bf2)
    return packed


def _full_spec(a):
    zeros = (0,) * a.ndim
    return pl.BlockSpec(a.shape, lambda i: zeros)


# ---------------------------------------------------------------------------
# Forward: one XLA gather-conv + one fused Pallas call
# ---------------------------------------------------------------------------
@functools.partial(jax.jit, static_argnums=(2,))
def forward(packed, x, out_dim):
    if x.ndim == 3:
        x = x[None]  # mirror PyTorch unsqueeze(0)
    N, C, H, W = x.shape
    k1, s1 = KERNELS[0], STRIDES[0]
    oh1, ow1 = conv2d_size_out(H, k1, s1), conv2d_size_out(W, k1, s1)
    oh2, ow2 = conv2d_size_out(oh1, KERNELS[1], STRIDES[1]), conv2d_size_out(ow1, KERNELS[1], STRIDES[1])
    oh3, ow3 = conv2d_size_out(oh2, KERNELS[2], STRIDES[2]), conv2d_size_out(ow2, KERNELS[2], STRIDES[2])
    m1, m2, m3 = oh1 * ow1, oh2 * ow2, oh3 * ow3
    k1sq_c = k1 * k1 * C

    # conv1 im2col: single fused XLA op, output already channel-last (no NCHW<->NHWC transposes)
    patches = jax.lax.conv_general_dilated(
        x, packed["im2col_w"], window_strides=(s1, s1), padding="VALID",
        dimension_numbers=("NCHW", "OIHW", "NHWC"),
        precision=jax.lax.Precision.HIGHEST)
    p1 = patches.reshape(N, m1, k1sq_c).astype(MXU_DTYPE)

    out_pad = packed["wf2"].shape[1]
    kern = _make_kernel(m1, m2, m3, KERNELS[1] ** 2, KERNELS[2] ** 2)

    args = (p1, packed["w1"], packed["sh1"],
            packed["sel2"], packed["w2"], packed["sh2"],
            packed["sel3"], packed["w3"], packed["sh3"],
            packed["wf1"], packed["bf1"], packed["wf2"], packed["bf2"])
    in_specs = [pl.BlockSpec((1, m1, k1sq_c), lambda i: (i, 0, 0))] + \
               [_full_spec(a) for a in args[1:]]

    out = pl.pallas_call(
        kern,
        out_shape=jax.ShapeDtypeStruct((N, 1, out_pad), jnp.float32),
        grid=(N,),
        in_specs=in_specs,
        out_specs=pl.BlockSpec((1, 1, out_pad), lambda i: (i, 0, 0)),
        compiler_params=pltpu.CompilerParams(
            dimension_semantics=("parallel",),
            vmem_limit_bytes=32 * 1024 * 1024),
    )(*args)
    return out[:, 0, :out_dim]


if __name__ == "__main__":
    # smallest spatial size the conv stack (k=8/4/3, s=4/2/1) accepts is 36x36
    in_dim = (4, 36, 36)   # (C, H, W)
    out_dim = 6
    batch = 2

    key = jax.random.PRNGKey(0)
    key, pkey, xkey = jax.random.split(key, 3)
    params = init_params(pkey, in_dim, out_dim)
    packed = pack_params(params, in_dim, out_dim)
    x = jax.random.normal(xkey, (batch,) + in_dim, dtype=jnp.float32)

    y = forward(packed, x, out_dim)
    jax.block_until_ready(y)
    assert y.shape == (batch, out_dim), y.shape
    print("KERNEL_OK")
</pallas_src>

<mosaic_0001>
module attributes {stable_mosaic.version = 11 : i64} {
  func.func @kernel(%arg0: i32, %arg1: memref<1x64x256xbf16, #tpu.memory_space<vmem>>, %arg2: memref<256x32xbf16, #tpu.memory_space<vmem>>, %arg3: memref<1x32xf32, #tpu.memory_space<vmem>>, %arg4: memref<144x64xbf16, #tpu.memory_space<vmem>>, %arg5: memref<512x64xbf16, #tpu.memory_space<vmem>>, %arg6: memref<1x64xf32, #tpu.memory_space<vmem>>, %arg7: memref<9x9xbf16, #tpu.memory_space<vmem>>, %arg8: memref<576x64xbf16, #tpu.memory_space<vmem>>, %arg9: memref<1x64xf32, #tpu.memory_space<vmem>>, %arg10: memref<64x512xbf16, #tpu.memory_space<vmem>>, %arg11: memref<1x512xf32, #tpu.memory_space<vmem>>, %arg12: memref<512x128xbf16, #tpu.memory_space<vmem>>, %arg13: memref<1x128xf32, #tpu.memory_space<vmem>>, %arg14: memref<1x1x128xf32, #tpu.memory_space<vmem>>) attributes {dimension_semantics = [#tpu.dimension_semantics<parallel>], iteration_bounds = array<i64: 2>, scalar_prefetch = 0 : i64, scratch_operands = 0 : i64, tpu.core_type = #tpu.core_type<tc>, window_params = [{transform_indices = @transform_0, window_bounds = array<i64: 1, 64, 256>}, {pipeline_mode = #tpu.pipeline_mode<synchronous>, transform_indices = @transform_1, window_bounds = array<i64: 256, 32>}, {pipeline_mode = #tpu.pipeline_mode<synchronous>, transform_indices = @transform_2, window_bounds = array<i64: 1, 32>}, {pipeline_mode = #tpu.pipeline_mode<synchronous>, transform_indices = @transform_3, window_bounds = array<i64: 144, 64>}, {pipeline_mode = #tpu.pipeline_mode<synchronous>, transform_indices = @transform_4, window_bounds = array<i64: 512, 64>}, {pipeline_mode = #tpu.pipeline_mode<synchronous>, transform_indices = @transform_5, window_bounds = array<i64: 1, 64>}, {pipeline_mode = #tpu.pipeline_mode<synchronous>, transform_indices = @transform_6, window_bounds = array<i64: 9, 9>}, {pipeline_mode = #tpu.pipeline_mode<synchronous>, transform_indices = @transform_7, window_bounds = array<i64: 576, 64>}, {pipeline_mode = #tpu.pipeline_mode<synchronous>, transform_indices = @transform_8, window_bounds = array<i64: 1, 64>}, {pipeline_mode = #tpu.pipeline_mode<synchronous>, transform_indices = @transform_9, window_bounds = array<i64: 64, 512>}, {pipeline_mode = #tpu.pipeline_mode<synchronous>, transform_indices = @transform_10, window_bounds = array<i64: 1, 512>}, {pipeline_mode = #tpu.pipeline_mode<synchronous>, transform_indices = @transform_11, window_bounds = array<i64: 512, 128>}, {pipeline_mode = #tpu.pipeline_mode<synchronous>, transform_indices = @transform_12, window_bounds = array<i64: 1, 128>}, {transform_indices = @transform_13, window_bounds = array<i64: 1, 1, 128>}]} {
    %c0 = arith.constant 0 : index
    %c0_0 = arith.constant 0 : index
    %c0_1 = arith.constant 0 : index
    %0 = vector.load %arg1[%c0, %c0_0, %c0_1] : memref<1x64x256xbf16, #tpu.memory_space<vmem>>, vector<1x64x256xbf16>
    %1 = vector.shape_cast %0 : vector<1x64x256xbf16> to vector<64x256xbf16>
    %c0_2 = arith.constant 0 : index
    %c0_3 = arith.constant 0 : index
    %2 = vector.load %arg2[%c0_2, %c0_3] : memref<256x32xbf16, #tpu.memory_space<vmem>>, vector<256x32xbf16>
    %cst = arith.constant dense<0.000000e+00> : vector<64x32xf32>
    %3 = tpu.matmul %1, %2, %cst {dimension_numbers = #tpu.dot_dimension_numbers<[1], [0], [0], [1], [0, 0, 1, 1], [], []>} : vector<64x256xbf16>, vector<256x32xbf16>, vector<64x32xf32> -> vector<64x32xf32>
    %c0_4 = arith.constant 0 : index
    %c0_5 = arith.constant 0 : index
    %4 = vector.load %arg3[%c0_4, %c0_5] : memref<1x32xf32, #tpu.memory_space<vmem>>, vector<1x32xf32>
    %5 = vector.broadcast %4 : vector<1x32xf32> to vector<64x32xf32>
    %6 = arith.addf %3, %5 : vector<64x32xf32>
    %cst_6 = arith.constant 0.000000e+00 : f32
    %7 = vector.broadcast %cst_6 : f32 to vector<64x32xf32>
    %8 = arith.cmpf oge, %6, %7 : vector<64x32xf32>
    %cst_7 = arith.constant 0.00999999977 : f32
    %9 = vector.broadcast %cst_7 : f32 to vector<64x32xf32>
    %10 = arith.mulf %9, %6 : vector<64x32xf32>
    %11 = arith.select %8, %6, %10 : vector<64x32xi1>, vector<64x32xf32>
    %c0_8 = arith.constant 0 : index
    %c0_9 = arith.constant 0 : index
    %12 = vector.load %arg4[%c0_8, %c0_9] : memref<144x64xbf16, #tpu.memory_space<vmem>>, vector<144x64xbf16>
    %c0_10 = arith.constant 0 : index
    %c0_11 = arith.constant 0 : index
    %13 = vector.load %arg5[%c0_10, %c0_11] : memref<512x64xbf16, #tpu.memory_space<vmem>>, vector<512x64xbf16>
    %c0_12 = arith.constant 0 : index
    %c0_13 = arith.constant 0 : index
    %14 = vector.load %arg6[%c0_12, %c0_13] : memref<1x64xf32, #tpu.memory_space<vmem>>, vector<1x64xf32>
    %15 = arith.truncf %11 : vector<64x32xf32> to vector<64x32xbf16>
    %cst_14 = arith.constant dense<0.000000e+00> : vector<144x32xf32>
    %16 = tpu.matmul %12, %15, %cst_14 {dimension_numbers = #tpu.dot_dimension_numbers<[1], [0], [0], [1], [0, 0, 1, 1], [], []>} : vector<144x64xbf16>, vector<64x32xbf16>, vector<144x32xf32> -> vector<144x32xf32>
    %17 = vector.extract_strided_slice %16 {offsets = [0, 0], sizes = [9, 32], strides = [1, 1]} : vector<144x32xf32> to vector<9x32xf32>
    %18 = vector.extract_strided_slice %16 {offsets = [9, 0], sizes = [9, 32], strides = [1, 1]} : vector<144x32xf32> to vector<9x32xf32>
    %19 = vector.extract_strided_slice %16 {offsets = [18, 0], sizes = [9, 32], strides = [1, 1]} : vector<144x32xf32> to vector<9x32xf32>
    %20 = vector.extract_strided_slice %16 {offsets = [27, 0], sizes = [9, 32], strides = [1, 1]} : vector<144x32xf32> to vector<9x32xf32>
    %21 = vector.extract_strided_slice %16 {offsets = [36, 0], sizes = [9, 32], strides = [1, 1]} : vector<144x32xf32> to vector<9x32xf32>
    %22 = vector.extract_strided_slice %16 {offsets = [45, 0], sizes = [9, 32], strides = [1, 1]} : vector<144x32xf32> to vector<9x32xf32>
    %23 = vector.extract_strided_slice %16 {offsets = [54, 0], sizes = [9, 32], strides = [1, 1]} : vector<144x32xf32> to vector<9x32xf32>
    %24 = vector.extract_strided_slice %16 {offsets = [63, 0], sizes = [9, 32], strides = [1, 1]} : vector<144x32xf32> to vector<9x32xf32>
    %25 = vector.extract_strided_slice %16 {offsets = [72, 0], sizes = [9, 32], strides = [1, 1]} : vector<144x32xf32> to vector<9x32xf32>
    %26 = vector.extract_strided_slice %16 {offsets = [81, 0], sizes = [9, 32], strides = [1, 1]} : vector<144x32xf32> to vector<9x32xf32>
    %27 = vector.extract_strided_slice %16 {offsets = [90, 0], sizes = [9, 32], strides = [1, 1]} : vector<144x32xf32> to vector<9x32xf32>
    %28 = vector.extract_strided_slice %16 {offsets = [99, 0], sizes = [9, 32], strides = [1, 1]} : vector<144x32xf32> to vector<9x32xf32>
    %29 = vector.extract_strided_slice %16 {offsets = [108, 0], sizes = [9, 32], strides = [1, 1]} : vector<144x32xf32> to vector<9x32xf32>
    %30 = vector.extract_strided_slice %16 {offsets = [117, 0], sizes = [9, 32], strides = [1, 1]} : vector<144x32xf32> to vector<9x32xf32>
    %31 = vector.extract_strided_slice %16 {offsets = [126, 0], sizes = [9, 32], strides = [1, 1]} : vector<144x32xf32> to vector<9x32xf32>
    %32 = vector.extract_strided_slice %16 {offsets = [135, 0], sizes = [9, 32], strides = [1, 1]} : vector<144x32xf32> to vector<9x32xf32>
    %33 = tpu.concatenate %17, %18, %19, %20, %21, %22, %23, %24, %25, %26, %27, %28, %29, %30, %31, %32 in 1 : vector<9x32xf32>, vector<9x32xf32>, vector<9x32xf32>, vector<9x32xf32>, vector<9x32xf32>, vector<9x32xf32>, vector<9x32xf32>, vector<9x32xf32>, vector<9x32xf32>, vector<9x32xf32>, vector<9x32xf32>, vector<9x32xf32>, vector<9x32xf32>, vector<9x32xf32>, vector<9x32xf32>, vector<9x32xf32> -> vector<9x512xf32>
    %34 = arith.truncf %33 : vector<9x512xf32> to vector<9x512xbf16>
    %cst_15 = arith.constant dense<0.000000e+00> : vector<9x64xf32>
    %35 = tpu.matmul %34, %13, %cst_15 {dimension_numbers = #tpu.dot_dimension_numbers<[1], [0], [0], [1], [0, 0, 1, 1], [], []>} : vector<9x512xbf16>, vector<512x64xbf16>, vector<9x64xf32> -> vector<9x64xf32>
    %36 = vector.broadcast %14 : vector<1x64xf32> to vector<9x64xf32>
    %37 = arith.addf %35, %36 : vector<9x64xf32>
    %cst_16 = arith.constant 0.000000e+00 : f32
    %38 = vector.broadcast %cst_16 : f32 to vector<9x64xf32>
    %39 = arith.cmpf oge, %37, %38 : vector<9x64xf32>
    %cst_17 = arith.constant 0.00999999977 : f32
    %40 = vector.broadcast %cst_17 : f32 to vector<9x64xf32>
    %41 = arith.mulf %40, %37 : vector<9x64xf32>
    %42 = arith.select %39, %37, %41 : vector<9x64xi1>, vector<9x64xf32>
    %c0_18 = arith.constant 0 : index
    %c0_19 = arith.constant 0 : index
    %43 = vector.load %arg7[%c0_18, %c0_19] : memref<9x9xbf16, #tpu.memory_space<vmem>>, vector<9x9xbf16>
    %c0_20 = arith.constant 0 : index
    %c0_21 = arith.constant 0 : index
    %44 = vector.load %arg8[%c0_20, %c0_21] : memref<576x64xbf16, #tpu.memory_space<vmem>>, vector<576x64xbf16>
    %c0_22 = arith.constant 0 : index
    %c0_23 = arith.constant 0 : index
    %45 = vector.load %arg9[%c0_22, %c0_23] : memref<1x64xf32, #tpu.memory_space<vmem>>, vector<1x64xf32>
    %46 = arith.truncf %42 : vector<9x64xf32> to vector<9x64xbf16>
    %cst_24 = arith.constant dense<0.000000e+00> : vector<9x64xf32>
    %47 = tpu.matmul %43, %46, %cst_24 {dimension_numbers = #tpu.dot_dimension_numbers<[1], [0], [0], [1], [0, 0, 1, 1], [], []>} : vector<9x9xbf16>, vector<9x64xbf16>, vector<9x64xf32> -> vector<9x64xf32>
    %48 = vector.extract_strided_slice %47 {offsets = [0, 0], sizes = [1, 64], strides = [1, 1]} : vector<9x64xf32> to vector<1x64xf32>
    %49 = vector.extract_strided_slice %47 {offsets = [1, 0], sizes = [1, 64], strides = [1, 1]} : vector<9x64xf32> to vector<1x64xf32>
    %50 = vector.extract_strided_slice %47 {offsets = [2, 0], sizes = [1, 64], strides = [1, 1]} : vector<9x64xf32> to vector<1x64xf32>
    %51 = vector.extract_strided_slice %47 {offsets = [3, 0], sizes = [1, 64], strides = [1, 1]} : vector<9x64xf32> to vector<1x64xf32>
    %52 = vector.extract_strided_slice %47 {offsets = [4, 0], sizes = [1, 64], strides = [1, 1]} : vector<9x64xf32> to vector<1x64xf32>
    %53 = vector.extract_strided_slice %47 {offsets = [5, 0], sizes = [1, 64], strides = [1, 1]} : vector<9x64xf32> to vector<1x64xf32>
    %54 = vector.extract_strided_slice %47 {offsets = [6, 0], sizes = [1, 64], strides = [1, 1]} : vector<9x64xf32> to vector<1x64xf32>
    %55 = vector.extract_strided_slice %47 {offsets = [7, 0], sizes = [1, 64], strides = [1, 1]} : vector<9x64xf32> to vector<1x64xf32>
    %56 = vector.extract_strided_slice %47 {offsets = [8, 0], sizes = [1, 64], strides = [1, 1]} : vector<9x64xf32> to vector<1x64xf32>
    %57 = tpu.concatenate %48, %49, %50, %51, %52, %53, %54, %55, %56 in 1 : vector<1x64xf32>, vector<1x64xf32>, vector<1x64xf32>, vector<1x64xf32>, vector<1x64xf32>, vector<1x64xf32>, vector<1x64xf32>, vector<1x64xf32>, vector<1x64xf32> -> vector<1x576xf32>
    %58 = arith.truncf %57 : vector<1x576xf32> to vector<1x576xbf16>
    %cst_25 = arith.constant dense<0.000000e+00> : vector<1x64xf32>
    %59 = tpu.matmul %58, %44, %cst_25 {dimension_numbers = #tpu.dot_dimension_numbers<[1], [0], [0], [1], [0, 0, 1, 1], [], []>} : vector<1x576xbf16>, vector<576x64xbf16>, vector<1x64xf32> -> vector<1x64xf32>
    %60 = arith.addf %59, %45 : vector<1x64xf32>
    %cst_26 = arith.constant 0.000000e+00 : f32
    %61 = vector.broadcast %cst_26 : f32 to vector<1x64xf32>
    %62 = arith.cmpf oge, %60, %61 : vector<1x64xf32>
    %cst_27 = arith.constant 0.00999999977 : f32
    %63 = vector.broadcast %cst_27 : f32 to vector<1x64xf32>
    %64 = arith.mulf %63, %60 : vector<1x64xf32>
    %65 = arith.select %62, %60, %64 : vector<1x64xi1>, vector<1x64xf32>
    %66 = arith.truncf %65 : vector<1x64xf32> to vector<1x64xbf16>
    %c0_28 = arith.constant 0 : index
    %c0_29 = arith.constant 0 : index
    %67 = vector.load %arg10[%c0_28, %c0_29] : memref<64x512xbf16, #tpu.memory_space<vmem>>, vector<64x512xbf16>
    %cst_30 = arith.constant dense<0.000000e+00> : vector<1x512xf32>
    %68 = tpu.matmul %66, %67, %cst_30 {dimension_numbers = #tpu.dot_dimension_numbers<[1], [0], [0], [1], [0, 0, 1, 1], [], []>} : vector<1x64xbf16>, vector<64x512xbf16>, vector<1x512xf32> -> vector<1x512xf32>
    %c0_31 = arith.constant 0 : index
    %c0_32 = arith.constant 0 : index
    %69 = vector.load %arg11[%c0_31, %c0_32] : memref<1x512xf32, #tpu.memory_space<vmem>>, vector<1x512xf32>
    %70 = arith.addf %68, %69 : vector<1x512xf32>
    %71 = math.tanh %70 : vector<1x512xf32>
    %72 = arith.truncf %71 : vector<1x512xf32> to vector<1x512xbf16>
    %c0_33 = arith.constant 0 : index
    %c0_34 = arith.constant 0 : index
    %73 = vector.load %arg12[%c0_33, %c0_34] : memref<512x128xbf16, #tpu.memory_space<vmem>>, vector<512x128xbf16>
    %cst_35 = arith.constant dense<0.000000e+00> : vector<1x128xf32>
    %74 = tpu.matmul %72, %73, %cst_35 {dimension_numbers = #tpu.dot_dimension_numbers<[1], [0], [0], [1], [0, 0, 1, 1], [], []>} : vector<1x512xbf16>, vector<512x128xbf16>, vector<1x128xf32> -> vector<1x128xf32>
    %c0_36 = arith.constant 0 : index
    %c0_37 = arith.constant 0 : index
    %75 = vector.load %arg13[%c0_36, %c0_37] : memref<1x128xf32, #tpu.memory_space<vmem>>, vector<1x128xf32>
    %76 = arith.addf %74, %75 : vector<1x128xf32>
    %c0_38 = arith.constant 0 : index
    %c0_39 = arith.constant 0 : index
    %c0_40 = arith.constant 0 : index
    %77 = vector.load %arg14[%c0_38, %c0_39, %c0_40] : memref<1x1x128xf32, #tpu.memory_space<vmem>>, vector<1x1x128xf32>
    %78 = vector.shape_cast %77 : vector<1x1x128xf32> to vector<1x128xf32>
    %79 = vector.shape_cast %76 : vector<1x128xf32> to vector<1x1x128xf32>
    tpu.vector_store %arg14[%c0_38, %c0_39, %c0_40], %79 {strides = array<i32>} : memref<1x1x128xf32, #tpu.memory_space<vmem>>, vector<1x1x128xf32>,
    return
  }
  func.func @transform_0(%arg0: i32) -> (i32, i32, i32) {
    %c0_i32 = arith.constant 0 : i32
    %c0_i32_0 = arith.constant 0 : i32
    %c0_i32_1 = arith.constant 0 : i32
    return %arg0, %c0_i32, %c0_i32_0 : i32, i32, i32
  }
  func.func @transform_1(%arg0: i32) -> (i32, i32) {
    %c0_i32 = arith.constant 0 : i32
    %c0_i32_0 = arith.constant 0 : i32
    %c0_i32_1 = arith.constant 0 : i32
    return %c0_i32, %c0_i32_0 : i32, i32
  }
  func.func @transform_2(%arg0: i32) -> (i32, i32) {
    %c0_i32 = arith.constant 0 : i32
    %c0_i32_0 = arith.constant 0 : i32
    %c0_i32_1 = arith.constant 0 : i32
    return %c0_i32, %c0_i32_0 : i32, i32
  }
  func.func @transform_3(%arg0: i32) -> (i32, i32) {
    %c0_i32 = arith.constant 0 : i32
    %c0_i32_0 = arith.constant 0 : i32
    %c0_i32_1 = arith.constant 0 : i32
    return %c0_i32, %c0_i32_0 : i32, i32
  }
  func.func @transform_4(%arg0: i32) -> (i32, i32) {
    %c0_i32 = arith.constant 0 : i32
    %c0_i32_0 = arith.constant 0 : i32
    %c0_i32_1 = arith.constant 0 : i32
    return %c0_i32, %c0_i32_0 : i32, i32
  }
  func.func @transform_5(%arg0: i32) -> (i32, i32) {
    %c0_i32 = arith.constant 0 : i32
    %c0_i32_0 = arith.constant 0 : i32
    %c0_i32_1 = arith.constant 0 : i32
    return %c0_i32, %c0_i32_0 : i32, i32
  }
  func.func @transform_6(%arg0: i32) -> (i32, i32) {
    %c0_i32 = arith.constant 0 : i32
    %c0_i32_0 = arith.constant 0 : i32
    %c0_i32_1 = arith.constant 0 : i32
    return %c0_i32, %c0_i32_0 : i32, i32
  }
  func.func @transform_7(%arg0: i32) -> (i32, i32) {
    %c0_i32 = arith.constant 0 : i32
    %c0_i32_0 = arith.constant 0 : i32
    %c0_i32_1 = arith.constant 0 : i32
    return %c0_i32, %c0_i32_0 : i32, i32
  }
  func.func @transform_8(%arg0: i32) -> (i32, i32) {
    %c0_i32 = arith.constant 0 : i32
    %c0_i32_0 = arith.constant 0 : i32
    %c0_i32_1 = arith.constant 0 : i32
    return %c0_i32, %c0_i32_0 : i32, i32
  }
  func.func @transform_9(%arg0: i32) -> (i32, i32) {
    %c0_i32 = arith.constant 0 : i32
    %c0_i32_0 = arith.constant 0 : i32
    %c0_i32_1 = arith.constant 0 : i32
    return %c0_i32, %c0_i32_0 : i32, i32
  }
  func.func @transform_10(%arg0: i32) -> (i32, i32) {
    %c0_i32 = arith.constant 0 : i32
    %c0_i32_0 = arith.constant 0 : i32
    %c0_i32_1 = arith.constant 0 : i32
    return %c0_i32, %c0_i32_0 : i32, i32
  }
  func.func @transform_11(%arg0: i32) -> (i32, i32) {
    %c0_i32 = arith.constant 0 : i32
    %c0_i32_0 = arith.constant 0 : i32
    %c0_i32_1 = arith.constant 0 : i32
    return %c0_i32, %c0_i32_0 : i32, i32
  }
  func.func @transform_12(%arg0: i32) -> (i32, i32) {
    %c0_i32 = arith.constant 0 : i32
    %c0_i32_0 = arith.constant 0 : i32
    %c0_i32_1 = arith.constant 0 : i32
    return %c0_i32, %c0_i32_0 : i32, i32
  }
  func.func @transform_13(%arg0: i32) -> (i32, i32, i32) {
    %c0_i32 = arith.constant 0 : i32
    %c0_i32_0 = arith.constant 0 : i32
    %c0_i32_1 = arith.constant 0 : i32
    return %arg0, %c0_i32, %c0_i32_0 : i32, i32, i32
  }
}

</mosaic_0001>

<bundles_post_ra>
// kernel: forward.1
= control target key start
LH: loop header
LB: loop body
LE: loop exit
PB: predicated region body
PF: predicated region fallthrough
CT: control target
= control target key end

     0   :  { %s4086_s0 = inlined_call_operand.vmem [shape: bf16[2,64,256], index: 0, kind: input, shape index: {}]   ;;  %s4087_s1 = inlined_call_operand.vmem [shape: bf16[256,32], index: 1, kind: input, shape index: {}]   ;;  %s4088_s2 = inlined_call_operand.vmem [shape: f32[1,32], index: 2, kind: input, shape index: {}]   ;;  %s4089_s3 = inlined_call_operand.vmem [shape: bf16[144,64], index: 3, kind: input, shape index: {}]   ;;  %s4090_s4 = inlined_call_operand.vmem [shape: bf16[512,64], index: 4, kind: input, shape index: {}]   ;;  %s4091_s5 = inlined_call_operand.vmem [shape: f32[1,64], index: 5, kind: input, shape index: {}]   ;;  %s4092_s6 = inlined_call_operand.vmem [shape: bf16[9,9], index: 6, kind: input, shape index: {}]   ;;  %s4093_s7 = inlined_call_operand.vmem [shape: bf16[576,64], index: 7, kind: input, shape index: {}]   ;;  %s4094_s8 = inlined_call_operand.vmem [shape: f32[1,64], index: 8, kind: input, shape index: {}]   ;;  %s4095_s9 = inlined_call_operand.vmem [shape: bf16[64,512], index: 9, kind: input, shape index: {}]   ;;  %s4096_s10 = inlined_call_operand.vmem [shape: f32[1,512], index: 10, kind: input, shape index: {}]   ;;  %s4097_s11 = inlined_call_operand.vmem [shape: bf16[512,128], index: 11, kind: input, shape index: {}]   ;;  %s4098_s12 = inlined_call_operand.vmem [shape: f32[1,128], index: 12, kind: input, shape index: {}]   ;;  %s4099_s13 = inlined_call_operand.hbm [shape: f32[2,1,128], index: 13, kind: output, shape index: {}]  }
   0x1   :  { %4103 = sst [smem:[#allocation8_spill]] %s4086_s0 }
   0x2   :  { %18 = vsyncpa [#allocation3], 0 }
   0x3   :  { %20 = vsyncpa [#allocation3 + $0x1], 0  ;;  %s3411_s25 = smov 0   ;;  %s3413_s26 = smov 0  }
   0x4   :  { %s3415_s27 = smov 0   ;;  %s3417_s28 = smov 0  }
   0x5 LB: > { %4104 = sst [smem:[#allocation5_spill]] %s3327_s27  ;;  %s3432_s29 = sadd.s32 4294967295, %s3331_s28   ;;  %s3331_s28 = sphi %s3417_s28, %s4110_s28   ;;  %s3327_s27 = sphi %s3415_s27, %s4112_s27   ;;  %s3323_s26 = sphi %s3413_s26, %s4114_s26   ;;  %s3319_s25 = sphi %s3411_s25, %s4113_s25  }
   0x6   : > { %s2556_s30 = sadd.s32 4294967294, %s3331_s28   ;;  %s3436_s14 = sadd.s32 1, %s3331_s28  }
   0x7   : > { %4105 = sst [smem:[#allocation6_spill]] %s3436_s14  ;;  %s311_s15 = sadd.s32 1, %s3327_s27 }
   0x8   : > { %s308_s16 = ssub.s32 %s3331_s28, %s3436_s14  ;;  %p321_p0 = scmp.ne.s32.totalorder %s3327_s27, %s3323_s26 }
   0x9   : > { %p309_p1 = scmp.eq.s32.totalorder %s308_s16, 0  ;;  %p322_p2 = scmp.eq.s32.totalorder %s3432_s29, 1 }
   0xa   : > { %p327_p3 = scmp.ne.s32.totalorder %s3323_s26, %s3319_s25  ;;  %p328_p4 = scmp.eq.s32.totalorder %s2556_s30, 1 }
   0xb   : > { %s3447_s17 = scalar_select %p309_p1, %s3327_s27, %s311_s15  }
   0xc   : > { %p3449_p5 = por %p322_p2, %p321_p0  ;;  %p3453_p6 = por %p328_p4, %p327_p3 }
   0xd   : > { %4106 = sst [smem:[#allocation7_spill]] %s3447_s17  ;;  %p2559_p7 = scmp.ge.s32.totalorder %s3331_s28, 1 }
   0xe   : > { %p390_p8 = scmp.lt.s32.totalorder %s3331_s28, 3 }
  0x10   : > { %p391_p9 = pnand %p2559_p7, %p390_p8 }
  0x11   : > { %p433_p10 = scmp.lt.s32.totalorder (!%p391_p9), %s3432_s29, 1  ;;  %s4109_s0 = sld [smem:[#allocation8_spill]] (!%p391_p9) }
  0x12   : > { %394 = sbr.rel (%p391_p9) target bundleno = 1865 (0x749), region = 72  ;;  %s3335_s14 = smov (!%p391_p9), 32  }
  0x13   : > { %s3336_s24 = smov (!%p391_p9), 64   ;;  %s3337_s17 = smov (!%p391_p9), 96  }
  0x14   : > { %s2727_s30 = sshll.u32 (!%p391_p9), %s3432_s29, 4 }
  0x17   : > { %v3101_v0 = vld [vmem:[%s4087_s1 + $0x78] sm:$0xff]   ;;  %v3103_v2 = vld [vmem:[%s4087_s1 + $0x70] sm:$0xff]   ;;  %v3105_v4 = vld [vmem:[%s4087_s1 + $0x68] sm:$0xff]   ;;  %s434_s23 = scalar_select %p433_p10, %s3432_s29, 1  ;;  %v3333_v24 = vmov 0.0   ;;  %vm3334_vm0 = vmmov 0  }
  0x18   : > { %v3102_v1 = vld [vmem:[%s4087_s1 + $0x38] sm:$0xff]   ;;  %2731 = vmatprep.subr.bf16.mxu0 %v3101_v0  ;;  %v3104_v3 = vld [vmem:[%s4087_s1 + $0x30] sm:$0xff]   ;;  %v3106_v5 = vld [vmem:[%s4087_s1 + $0x28] sm:$0xff]   ;;  %2923 = vmatprep.subr.bf16.mxu1 %v3333_v24  ;;  %vm843_vm9 = vcmask 523264   ;;  %vm978_vm10 = vcmask 1046528   ;;  %vm989_vm11 = vcmask 1045504  }
  0x19   : > { %2732 = vmatpush3.bf16.msra.mxu0 %v3102_v1  ;;  %v3107_v6 = vld [vmem:[%s4087_s1 + $0x60] sm:$0xff]   ;;  %s2730_s27 = sshll.u32 %s434_s23, 6  ;;  %v3109_v8 = vld [vmem:[%s4087_s1 + $0x58] sm:$0xff]   ;;  %v3111_v10 = vld [vmem:[%s4087_s1 + $0x50] sm:$0xff]   ;;  %2931 = vmatprep.mubr.msk.bf16.mxu1 %vm3334_vm0, %v3333_v24  ;;  %vm1000_vm12 = vcmask 1044480   ;;  %vm1011_vm13 = vcmask 1043456  }
  0x1a   : > { %2733 = vmatprep.subr.bf16.mxu0 %v3103_v2  ;;  %v3108_v7 = vld [vmem:[%s4087_s1 + $0x20] sm:$0xff]   ;;  %s3491_s22 = scalar_lea.vmem %s4109_s0, %s2730_s27  ;;  %v3110_v9 = vld [vmem:[%s4087_s1 + $0x18] sm:$0xff]   ;;  %v3112_v12 = vld [vmem:[%s4087_s1 + $0x10] sm:$0xff]   ;;  %vm1018_vm14 = vcmask 1042432   ;;  %vm1029_vm15 = vcmask 1041408   ;;  %s431_s27 = sand.u32 1, %s3323_s26  }
  0x1b   : > { %v3119_v11 = vld [vmem:[%s3491_s22 + $0x4] ss:$8 sps:$4 sm:$0xff]   ;;  %v3117_v17 = vld [vmem:[%s3491_s22] ss:$8 sps:$4 sm:$0xff]   ;;  %v3120_v18 = vld [vmem:[%s3491_s22 + $0x14] ss:$8 sps:$4 sm:$0xff]  }
  0x1c   : > { %654 = vmatprep.mubr.bf16.mxu0 %v3119_v11  ;;  %v3113_v13 = vld [vmem:[%s4087_s1 + $0x48] sm:$0xff]   ;;  %v3115_v15 = vld [vmem:[%s4087_s1 + $0x40] sm:$0xff]   ;;  %v3122_v19 = vld [vmem:[%s3491_s22 + $0x10] ss:$8 sps:$4 sm:$0xff]   ;;  %s432_s15 = scalar_lea.vmem [#allocation2], %s431_s27  ;;  %s2489_s16 = scalar_lea.sflag [#allocation3], %s431_s27 }
  0x1d   : > { %2734 = vmatpush3.bf16.msra.mxu0 %v3104_v3  ;;  %v3114_v14 = vld [vmem:[%s4087_s1 + $0x8] sm:$0xff]   ;;  %v3116_v16 = vld [vmem:[%s4087_s1] sm:$0xff]   ;;  %v3126_v22 = vld [vmem:[%s3491_s22 + $0x34] ss:$8 sps:$4 sm:$0xff]   ;;  %s3340_s29 = smov [#allocation2]  }
  0x1e   : > { %2735 = vmatprep.subr.bf16.mxu0 %v3105_v4  ;;  %v3123_v20 = vld [vmem:[%s3491_s22 + $0x24] ss:$8 sps:$4 sm:$0xff]   ;;  %v3125_v21 = vld [vmem:[%s3491_s22 + $0x20] ss:$8 sps:$4 sm:$0xff]   ;;  %v3128_v23 = vld [vmem:[%s3491_s22 + $0x30] ss:$8 sps:$4 sm:$0xff]   ;;  %s2499_s22 = scalar_lea.hbm %s4099_s13, %s2727_s30 }
  0x1f   : > { %v2562_v41 = vld [vmem:[%s4088_s2] ss:$0 sm:$0xff]  ;;  %s3275_s21 = sshll.u32 %s3340_s29, 4  ;;  %s3276_s21 = int_to_ptr.vmem [resolvable:$false] %s3275_s21 }
  0x21   : > { %2736 = vmatpush3.bf16.msra.mxu0 %v3106_v5 }
  0x22   : > { %2737 = vmatprep.subr.bf16.mxu0 %v3107_v6 }
  0x25   : > { %2738 = vmatpush3.bf16.msra.mxu0 %v3108_v7 }
  0x26   : > { %2739 = vmatprep.subr.bf16.mxu0 %v3109_v8 }
  0x29   : > { %2740 = vmatpush3.bf16.msra.mxu0 %v3110_v9 }
  0x2a   : > { %2741 = vmatprep.subr.bf16.mxu0 %v3111_v10 }
  0x2d   : > { %2742 = vmatpush3.bf16.msra.mxu0 %v3112_v12 }
  0x2e   : > { %2743 = vmatprep.subr.bf16.mxu0 %v3113_v13 }
  0x31   : > { %2744 = vmatpush3.bf16.msra.mxu0 %v3114_v14  ;;  %v3129_v14 = vld [vmem:[%s4089_s3] sm:$0xff]  }
  0x32   : > { %2745 = vmatprep.subr.bf16.mxu0 %v3115_v15  ;;  %v3130_v15 = vld [vmem:[%s4089_s3 + $0x8] sm:$0xff]  }
  0x35   : > { %2746 = vmatpush3.bf16.msra.mxu0 %v3116_v16  ;;  %v3131_v16 = vld [vmem:[%s4089_s3 + $0x10] sm:$0xff]  }
  0x38   : > { %655 = vmatmul.mubr.bf16.vlgmr.msra.gmra.mxu0 %v3117_v17  ;;  %v3132_v17 = vld [vmem:[%s4089_s3 + $0x18] sm:$0xff]  }
  0x39   : > { %662 = vmatprep.mubr.bf16.mxu0 %v3120_v18  ;;  %v3133_v18 = vld [vmem:[%s4089_s3 + $0x20] sm:$0xff]  }
  0x40   : > { %663 = vmatmul.mubr.bf16.gmra.mxu0 %v3122_v19  ;;  %v3134_v19 = vld [vmem:[%s4089_s3 + $0x28] sm:$0xff]  }
  0x41   : > { %670 = vmatprep.mubr.bf16.mxu0 %v3123_v20  ;;  %v3135_v20 = vld [vmem:[%s4089_s3 + $0x30] sm:$0xff]  }
  0x48   : > { %671 = vmatmul.mubr.bf16.gmra.mxu0 %v3125_v21  ;;  %v3136_v21 = vld [vmem:[%s4089_s3 + $0x38] sm:$0xff]  }
  0x49   : > { %678 = vmatprep.mubr.bf16.mxu0 %v3126_v22  ;;  %v3137_v22 = vld [vmem:[%s4089_s3 + $0x40] sm:$0xff]  }
  0x50   : > { %679 = vmatmul.mubr.bf16.gmra.mxu0 %v3128_v23  ;;  %v3138_v23 = vld [vmem:[%s4090_s4 + $0x78] sm:$0xff]  }
  0x51   : > { %2784 = vmatprep.subr.bf16.mxu0 %v3138_v23  ;;  %v3163_v23 = vld [vmem:[%s4090_s4 + $0x98] sm:$0xff]  }
  0xf8   : > { %v2747_v25 = vpop.f32.mrf.mxu0 }
  0xfa   : > { %v2748_v26 = vpop.f32.mrf.mxu0 }
  0xfb   : > { %v2749_v57 = vadd.f32 %v2748_v26, %v2747_v25  ;;  %v3139_v25 = vld [vmem:[%s4090_s4 + $0xf8] sm:$0xff]  }
  0xfc   : > { %v2750_v27 = vpop.f32.mrf.mxu0  ;;  %v3140_v26 = vld [vmem:[%s4090_s4 + $0x38] sm:$0xff]  }
  0xfd   : > { %v657_v2 = vadd.f32 %v2749_v57, %v2562_v41  ;;  %2785 = vmatpush3.bf16.msra.mxu0 %v3140_v26  ;;  %v3154_v57 = vld [vmem:[%s4090_s4 + $0x50] sm:$0xff]  }
  0xfe   : > { %v2751_v28 = vpop.f32.mrf.mxu0 }
  0xff   : > { %v2752_v53 = vadd.f32 %v2751_v28, %v2750_v27  ;;  %v695_v8 = vmul.f32 0.01, %v657_v2  ;;  %vm687_vm8 = vcmp.ge.f32.partialorder %v657_v2, 0.0  ;;  %v3141_v27 = vld [vmem:[%s4090_s4 + $0xb8] sm:$0xff]  }
 0x100   : > { %v2753_v29 = vpop.f32.mrf.mxu0 }
 0x101   : > { %v660_v63 = vadd.f32 %v2752_v53, %v2562_v41  ;;  %v703_v12 = vsel %vm687_vm8, %v657_v2, %v695_v8 }
 0x102   : > { %v2754_v30 = vpop.f32.mrf.mxu0 }
 0x103   : > { %v2755_v49 = vadd.f32 %v2754_v30, %v2753_v29  ;;  %v696_v6 = vmul.f32 0.01, %v660_v63  ;;  %vm688_vm7 = vcmp.ge.f32.partialorder %v660_v63, 0.0  ;;  %v3142_v29 = vld [vmem:[%s4090_s4 + $0x70] sm:$0xff]  }
 0x104   : > { %v2756_v31 = vpop.f32.mrf.mxu0  ;;  %2786 = vmatprep.subr.bf16.mxu0 %v3142_v29 }
 0x105   : > { %v665_v58 = vadd.f32 %v2755_v49, %v2562_v41  ;;  %v704_v11 = vsel %vm688_vm7, %v660_v63, %v696_v6 }
 0x106   : > { %v2757_v32 = vpop.f32.mrf.mxu0  ;;  %v794_v13 = vpack.c.bf16 %v704_v11, %v703_v12  ;;  %v3159_v11 = vld [vmem:[%s4090_s4 + $0x40] sm:$0xff]  }
 0x107   : > { %v2758_v46 = vadd.f32 %v2757_v32, %v2756_v31  ;;  %v697_v3 = vmul.f32 0.01, %v665_v58  ;;  %vm689_vm6 = vcmp.ge.f32.partialorder %v665_v58, 0.0  ;;  %v3143_v31 = vld [vmem:[%s4090_s4 + $0x30] sm:$0xff]   ;;  %v3160_v12 = vld [vmem:[%s4090_s4 + $0xa0] sm:$0xff]  }
 0x108   : > { %v2759_v33 = vpop.f32.mrf.mxu0  ;;  %2787 = vmatpush3.bf16.msra.mxu0 %v3143_v31 }
 0x109   : > { %v668_v54 = vadd.f32 %v2758_v46, %v2562_v41  ;;  %v705_v9 = vsel %vm689_vm6, %v665_v58, %v697_v3  ;;  %v3147_v46 = vld [vmem:[%s4090_s4 + $0xb0] sm:$0xff]   ;;  %v3156_v3 = vld [vmem:[%s4090_s4 + $0x48] sm:$0xff]   ;;  %vm1514_vm6 = vcmask 72704  }
 0x10a   : > { %v2760_v34 = vpop.f32.mrf.mxu0 }
 0x10b   : > { %v2761_v43 = vadd.f32 %v2760_v34, %v2759_v33  ;;  %v698_v0 = vmul.f32 0.01, %v668_v54  ;;  %vm690_vm5 = vcmp.ge.f32.partialorder %v668_v54, 0.0  ;;  %v3144_v33 = vld [vmem:[%s4090_s4 + $0x68] sm:$0xff]  }
 0x10c   : > { %v2762_v35 = vpop.f32.mrf.mxu0  ;;  %2788 = vmatprep.subr.bf16.mxu0 %v3144_v33 }
 0x10d   : > { %v673_v50 = vadd.f32 %v2761_v43, %v2562_v41  ;;  %v706_v7 = vsel %vm690_vm5, %v668_v54, %v698_v0 }
 0x10e   : > { %v2763_v36 = vpop.f32.mrf.mxu0  ;;  %v795_v10 = vpack.c.bf16 %v706_v7, %v705_v9 }
 0x10f   : > { %v2764_v39 = vadd.f32 %v2763_v36, %v2762_v35  ;;  %v699_v59 = vmul.f32 0.01, %v673_v50  ;;  %vm691_vm4 = vcmp.ge.f32.partialorder %v673_v50, 0.0  ;;  %v3145_v35 = vld [vmem:[%s4090_s4 + $0x28] sm:$0xff]   ;;  %v3146_v36 = vld [vmem:[%s4090_s4 + $0xf0] sm:$0xff]  }
 0x110   : > { %v2765_v37 = vpop.f32.mrf.mxu0  ;;  %2789 = vmatpush3.bf16.msra.mxu0 %v3145_v35 }
 0x111   : > { %v676_v47 = vadd.f32 %v2764_v39, %v2562_v41  ;;  %v707_v4 = vsel %vm691_vm4, %v673_v50, %v699_v59  ;;  %v3155_v59 = vld [vmem:[%s4090_s4 + $0x10] sm:$0xff]  }
 0x112   : > { %v2766_v38 = vpop.f32.mrf.mxu0 }
 0x113   : > { %v2767_v40 = vadd.f32 %v2766_v38, %v2765_v37  ;;  %v700_v55 = vmul.f32 0.01, %v676_v47  ;;  %vm692_vm3 = vcmp.ge.f32.partialorder %v676_v47, 0.0 }
 0x114   : > { %v2768_v42 = vpop.f32.mrf.mxu0 }
 0x115   : > { %v681_v44 = vadd.f32 %v2767_v40, %v2562_v41  ;;  %v708_v1 = vsel %vm692_vm3, %v676_v47, %v700_v55  ;;  %v3148_v40 = vld [vmem:[%s4090_s4 + $0x60] sm:$0xff]   ;;  %v3150_v47 = vld [vmem:[%s4090_s4 + $0x58] sm:$0xff]   ;;  %vm1122_vm3 = vcmask 785408  }
 0x116   : > { %v2769_v45 = vpop.f32.mrf.mxu0  ;;  %v796_v5 = vpack.c.bf16 %v708_v1, %v707_v4  ;;  %2790 = vmatprep.subr.bf16.mxu0 %v3148_v40 }
 0x117   : > { %v2770_v48 = vadd.f32 %v2769_v45, %v2768_v42  ;;  %v701_v52 = vmul.f32 0.01, %v681_v44  ;;  %vm693_vm1 = vcmp.ge.f32.partialorder %v681_v44, 0.0  ;;  %v3149_v42 = vld [vmem:[%s4090_s4 + $0x20] sm:$0xff]  }
 0x118   : > { %2791 = vmatpush3.bf16.msra.mxu0 %v3149_v42 }
 0x119   : > { %v684_v51 = vadd.f32 %v2770_v48, %v2562_v41  ;;  %v709_v60 = vsel %vm693_vm1, %v681_v44, %v701_v52  ;;  %v3151_v48 = vld [vmem:[%s4090_s4 + $0x18] sm:$0xff]   ;;  %2792 = vmatprep.subr.bf16.mxu0 %v3150_v47  ;;  %vm1040_vm1 = vcmask 1040384  }
 0x11b   : > { %vm694_vm2 = vcmp.ge.f32.partialorder %v684_v51, 0.0  ;;  %v702_v56 = vmul.f32 0.01, %v684_v51 }
 0x11c   : > { %2793 = vmatpush3.bf16.msra.mxu0 %v3151_v48 }
 0x11d   : > { %v710_v61 = vsel %vm694_vm2, %v684_v51, %v702_v56  ;;  %2794 = vmatprep.subr.bf16.mxu0 %v3154_v57  ;;  %vm1117_vm2 = vcmask 261120  }
 0x11e   : > { %v797_v62 = vpack.c.bf16 %v710_v61, %v709_v60  ;;  %v3152_v61 = vld [vmem:[%s4090_s4 + $0xe8] sm:$0xff]  }
 0x120   : > { %2924 = vmatpush3.bf16.msra.mxu1 %v797_v62  ;;  %v3153_v62 = vld [vmem:[%s4090_s4 + $0xa8] sm:$0xff]   ;;  %2795 = vmatpush3.bf16.msra.mxu0 %v3155_v59 }
 0x121   : > { %2925 = vmatprep.subr.bf16.mxu1 %v3333_v24  ;;  %2796 = vmatprep.subr.bf16.mxu0 %v3156_v3  ;;  %v3168_v3 = vld [vmem:[%s4090_s4 + $0xc0] sm:$0xff]  }
 0x124   : > { %2926 = vmatpush3.bf16.msra.mxu1 %v796_v5  ;;  %v3157_v5 = vld [vmem:[%s4090_s4 + $0x8] sm:$0xff]  }
 0x125   : > { %2927 = vmatprep.subr.bf16.mxu1 %v3333_v24  ;;  %2797 = vmatpush3.bf16.msra.mxu0 %v3157_v5 }
 0x126   : > { %2798 = vmatprep.subr.bf16.mxu0 %v3159_v11 }
 0x128   : > { %2928 = vmatpush3.bf16.msra.mxu1 %v795_v10  ;;  %v3158_v10 = vld [vmem:[%s4090_s4 + $0xe0] sm:$0xff]  }
 0x129   : > { %2929 = vmatprep.subr.bf16.mxu1 %v3333_v24 }
 0x12c   : > { %2930 = vmatpush3.bf16.msra.mxu1 %v794_v13 }
 0x12d   : > { %2806 = vmatprep.subr.bf16.mxu1 %v3139_v25 }
 0x12f   : > { %2932 = vmatmul.mubr.msk.bf16.vlgmr.msra.gmra.mxu1 %vm843_vm9, %v3129_v14  ;;  %v3161_v14 = vld [vmem:[%s4090_s4] sm:$0xff]  }
 0x130   : > { %2935 = vmatprep.mubr.msk.bf16.mxu1 %vm3334_vm0, %v3333_v24  ;;  %2807 = vmatpush3.bf16.msra.mxu1 %v3141_v27 }
 0x131   : > { %2808 = vmatprep.subr.bf16.mxu1 %v3146_v36  ;;  %2799 = vmatpush3.bf16.msra.mxu0 %v3161_v14 }
 0x132   : > { %2967 = vmatprep.subr.bf16.mxu0 %v3333_v24 }
 0x134   : > { %2809 = vmatpush3.bf16.msra.mxu1 %v3147_v46 }
 0x135   : > { %2810 = vmatprep.subr.bf16.mxu1 %v3152_v61 }
 0x137   : > { %2936 = vmatmul.mubr.msk.bf16.gmra.mxu1 %vm843_vm9, %v3130_v15 }
 0x138   : > { %2939 = vmatprep.mubr.msk.bf16.mxu1 %vm3334_vm0, %v3333_v24  ;;  %2811 = vmatpush3.bf16.msra.mxu1 %v3153_v62 }
 0x139   : > { %2812 = vmatprep.subr.bf16.mxu1 %v3158_v10 }
 0x13c   : > { %2813 = vmatpush3.bf16.msra.mxu1 %v3160_v12 }
 0x13f   : > { %2940 = vmatmul.mubr.msk.bf16.gmra.mxu1 %vm843_vm9, %v3131_v16 }
 0x140   : > { %2943 = vmatprep.mubr.msk.bf16.mxu1 %vm3334_vm0, %v3333_v24 }
 0x147   : > { %2944 = vmatmul.mubr.msk.bf16.gmra.mxu1 %vm843_vm9, %v3132_v17 }
 0x148   : > { %2947 = vmatprep.mubr.msk.bf16.mxu1 %vm3334_vm0, %v3333_v24 }
 0x14f   : > { %2948 = vmatmul.mubr.msk.bf16.gmra.mxu1 %vm843_vm9, %v3133_v18 }
 0x150   : > { %2951 = vmatprep.mubr.msk.bf16.mxu1 %vm3334_vm0, %v3333_v24 }
 0x157   : > { %2952 = vmatmul.mubr.msk.bf16.gmra.mxu1 %vm843_vm9, %v3134_v19 }
 0x158   : > { %2955 = vmatprep.mubr.msk.bf16.mxu1 %vm3334_vm0, %v3333_v24 }
 0x15f   : > { %2956 = vmatmul.mubr.msk.bf16.gmra.mxu1 %vm843_vm9, %v3135_v20 }
 0x160   : > { %2959 = vmatprep.mubr.msk.bf16.mxu1 %vm3334_vm0, %v3333_v24 }
 0x167   : > { %2960 = vmatmul.mubr.msk.bf16.gmra.mxu1 %vm843_vm9, %v3136_v21 }
 0x168   : > { %2963 = vmatprep.mubr.msk.bf16.mxu1 %vm3334_vm0, %v3333_v24 }
 0x16f   : > { %2964 = vmatmul.mubr.msk.bf16.gmra.mxu1 %vm843_vm9, %v3137_v22  ;;  %v3162_v22 = vld [vmem:[%s4090_s4 + $0xd8] sm:$0xff]  }
 0x170   : > { %2814 = vmatprep.subr.bf16.mxu1 %v3162_v22 }
 0x171   : > { %2815 = vmatpush3.bf16.msra.mxu1 %v3163_v23 }
 0x1ef   : > { %v3595_v28 = vpop.f32.mrf.mxu1 }
 0x1f1   : > { %v2933_v30 = vpop.f32.mrf.mxu1 }
 0x1f3   : > { %v3603_v32 = vpop.f32.mrf.mxu1 }
 0x1f4   : > { %v979_v38 = vrot.slane %v3603_v32, 1 }
 0x1f5   : > { %v2934_v34 = vpop.f32.mrf.mxu1 }
 0x1f7   : > { %v913_v37 = vpop.f32.mrf.mxu1 }
 0x1f8   : > { %v980_v39 = vrot.slane %v913_v37, 1  ;;  %v990_v49 = vrot.slane %v913_v37, 2 }
 0x1f9   : > { %v2937_v41 = vpop.f32.mrf.mxu1 }
 0x1fa   : > { %v981_v43 = vsel %vm978_vm10, %v979_v38, %v980_v39  ;;  %v3164_v38 = vld [vmem:[%s4090_s4 + $0xd0] sm:$0xff]  }
 0x1fb   : > { %v916_v44 = vpop.f32.mrf.mxu1  ;;  %v3031_v45 = vpack.i.bf16 %v980_v39, %v981_v43  ;;  %v3165_v39 = vld [vmem:[%s4090_s4 + $0x90] sm:$0xff]   ;;  %2816 = vmatprep.subr.bf16.mxu1 %v3164_v38 }
 0x1fc   : > { %v991_v50 = vrot.slane %v916_v44, 2  ;;  %v1001_v55 = vrot.slane %v916_v44, 3  ;;  %2817 = vmatpush3.bf16.msra.mxu1 %v3165_v39 }
 0x1fd   : > { %3032 = vrot.lane.b32.xlu0 %v3031_v45, %s3335_s14  ;;  %v2938_v51 = vpop.f32.mrf.mxu1 }
 0x1fe   : > { %v992_v52 = vsel %vm989_vm11, %v990_v49, %v991_v50 }
 0x1ff   : > { %v921_v53 = vpop.f32.mrf.mxu1  ;;  %v3036_v54 = vpack.i.bf16 %v991_v50, %v992_v52 }
 0x200   : > { %v1002_v56 = vrot.slane %v921_v53, 3  ;;  %v1012_v1 = vrot.slane %v921_v53, 4 }
 0x201   : > { %3037 = vrot.lane.b32.xlu1 %v3036_v54, %s3336_s24  ;;  %v2941_v58 = vpop.f32.mrf.mxu1  ;;  %v3166_v54 = vld [vmem:[%s4090_s4 + $0xc8] sm:$0xff]  }
 0x202   : > { %v1003_v60 = vsel %vm1000_vm12, %v1001_v55, %v1002_v56  ;;  %v3167_v55 = vld [vmem:[%s4090_s4 + $0x88] sm:$0xff]   ;;  %2818 = vmatprep.subr.bf16.mxu1 %v3166_v54 }
 0x203   : > { %v3041_v63 = vpack.i.bf16 %v1002_v56, %v1003_v60  ;;  %v3647_v0 = vpop.f32.mrf.mxu1  ;;  %2819 = vmatpush3.bf16.msra.mxu1 %v3167_v55 }
 0x204   : > { %v1013_v2 = vrot.slane %v3647_v0, 4  ;;  %v1019_v8 = vrot.slane %v3647_v0, 5  ;;  %2820 = vmatprep.subr.bf16.mxu1 %v3168_v3 }
 0x205   : > { %3042 = vrot.lane.b32.xlu0 %v3041_v63, %s3337_s17  ;;  %v2942_v4 = vpop.f32.mrf.mxu1 }
 0x206   : > { %v3660_v6 = vsel %vm1011_vm13, %v1012_v1, %v1013_v2  ;;  %v3169_v4 = vld [vmem:[%s4090_s4 + $0x80] sm:$0xff]  }
 0x207   : > { %v929_v7 = vpop.f32.mrf.mxu1  ;;  %2821 = vmatpush3.bf16.msra.mxu1 %v3169_v4 }
 0x208   : > { %v1020_v9 = vrot.slane %v929_v7, 5  ;;  %v1030_v18 = vrot.slane %v929_v7, 6 }
 0x209   : > { %v2945_v13 = vpop.f32.mrf.mxu1 }
 0x20a   : > { %v1021_v15 = vsel %vm1018_vm14, %v1019_v8, %v1020_v9 }
 0x20b   : > { %v3046_v16 = vpack.i.bf16 %v1020_v9, %v1021_v15  ;;  %v932_v17 = vpop.f32.mrf.mxu1 }
 0x20c   : > { %v1031_v19 = vrot.slane %v932_v17, 6  ;;  %v1041_v27 = vrot.slane %v932_v17, 7 }
 0x20d   : > { %3047 = vrot.lane.b32.xlu0 %v3046_v16, %s3335_s14  ;;  %v2946_v20 = vpop.f32.mrf.mxu1 }
 0x20e   : > { %v1032_v21 = vsel %vm1029_vm15, %v1030_v18, %v1031_v19 }
 0x20f   : > { %v3051_v25 = vpack.i.bf16 %v1031_v19, %v1032_v21  ;;  %v937_v26 = vpop.f32.mrf.mxu1 }
 0x210   : > { %v1042_v29 = vrot.slane %v937_v26, 7 }
 0x211   : > { %3052 = vrot.lane.b32.xlu1 %v3051_v25, %s3336_s24  ;;  %v2949_v30 = vpop.f32.mrf.mxu1 }
 0x212   : > { %v1043_v31 = vsel %vm1040_vm1, %v1041_v27, %v1042_v29 }
 0x213   : > { %v3056_v33 = vpack.i.bf16 %v1042_v29, %v1043_v31  ;;  %v3687_v34 = vpop.f32.mrf.mxu1 }
 0x215   : > { %3057 = vrot.lane.b32.xlu0 %v3056_v33, %s3337_s17  ;;  %v2950_v35 = vpop.f32.mrf.mxu1 }
 0x217   : > { %v3690_v36 = vpop.f32.mrf.mxu1 }
 0x218   : > { %v1052_v41 = vrot.slane %v3690_v36, 1 }
 0x219   : > { %v2953_v37 = vpop.f32.mrf.mxu1 }
 0x21b   : > { %v948_v40 = vpop.f32.mrf.mxu1 }
 0x21c   : > { %v1053_v42 = vrot.slane %v948_v40, 1  ;;  %v1062_v47 = vrot.slane %v948_v40, 2 }
 0x21d   : > { %v2954_v43 = vpop.f32.mrf.mxu1 }
 0x21e   : > { %v1054_v44 = vsel %vm978_vm10, %v1052_v41, %v1053_v42 }
 0x21f   : > { %v3061_v45 = vpack.i.bf16 %v1053_v42, %v1054_v44  ;;  %v953_v46 = vpop.f32.mrf.mxu1 }
 0x220   : > { %v1063_v48 = vrot.slane %v953_v46, 2  ;;  %v1072_v7 = vrot.slane %v953_v46, 3 }
 0x221   : > { %3062 = vrot.lane.b32.xlu1 %v3061_v45, %s3335_s14  ;;  %v2957_v49 = vpop.f32.mrf.mxu1 }
 0x222   : > { %v1064_v50 = vsel %vm989_vm11, %v1062_v47, %v1063_v48 }
 0x223   : > { %v3066_v51 = vpack.i.bf16 %v1063_v48, %v1064_v50  ;;  %v956_v52 = vpop.f32.mrf.mxu1 }
 0x224   : > { %v1082_v57 = vrot.slane %v956_v52, 4  ;;  %v1073_v62 = vrot.slane %v956_v52, 3 }
 0x225   : > { %3067 = vrot.lane.b32.xlu1 %v3066_v51, %s3336_s24  ;;  %v2958_v53 = vpop.f32.mrf.mxu1 }
 0x226   : > { %v1074_v11 = vsel %vm1000_vm12, %v1072_v7, %v1073_v62 }
 0x227   : > { %v3709_v56 = vpop.f32.mrf.mxu1  ;;  %v3086_v16 = vpack.i.bf16 %v1073_v62, %v1074_v11 }
 0x228   : > { %v1083_v58 = vrot.slane %v3709_v56, 4  ;;  %v1088_v63 = vrot.slane %v3709_v56, 5 }
 0x229   : > { %v2961_v59 = vpop.f32.mrf.mxu1 }
 0x22a   : > { %v3715_v60 = vsel %vm1011_vm13, %v1082_v57, %v1083_v58 }
 0x22b   : > { %v964_v61 = vpop.f32.mrf.mxu1 }
 0x22c   : > { %v1089_v1 = vrot.slane %v964_v61, 5  ;;  %v1098_v12 = vrot.slane %v964_v61, 6 }
 0x22d   : > { %v2962_v5 = vpop.f32.mrf.mxu1 }
 0x22e   : > { %v1090_v8 = vsel %vm1018_vm14, %v1088_v63, %v1089_v1 }
 0x22f   : > { %v3071_v9 = vpack.i.bf16 %v1089_v1, %v1090_v8  ;;  %v969_v10 = vpop.f32.mrf.mxu1 }
 0x230   : > { %v1099_v13 = vrot.slane %v969_v10, 6  ;;  %v1108_v19 = vrot.slane %v969_v10, 7 }
 0x231   : > { %3072 = vrot.lane.b32.xlu1 %v3071_v9, %s3335_s14  ;;  %v2965_v14 = vpop.f32.mrf.mxu1  ;;  %s2501_s14 = sshll.u32 %s432_s15, 4  ;;  %s2502_s14 = int_to_ptr.vmem [resolvable:$true] %s2501_s14 }
 0x232   : > { %v1100_v15 = vsel %vm1029_vm15, %v1098_v12, %v1099_v13  ;;  %s3271_s20 = scalar_lea.vmem %s2502_s14, 16  ;;  %p3278_p0 = scmp.lt.s32.totalorder %s2502_s14, %s3276_s21 }
 0x233   : > { %v3076_v17 = vpack.i.bf16 %v1099_v13, %v1100_v15  ;;  %v972_v18 = vpop.f32.mrf.mxu1  ;;  %p3272_p11 = scmp.ne.s32.totalorder %s2502_s14, %s3271_s20 }
 0x234   : > { %v1109_v20 = vrot.slane %v972_v18, 7 }
 0x235   : > { %3087 = vrot.lane.b32.xlu1 %v3086_v16, %s3337_s17  ;;  %3077 = vrot.lane.b32.xlu0 %v3076_v17, %s3336_s24  ;;  %v2966_v21 = vpop.f32.mrf.mxu1  ;;  %p3273_p12 = pnand %p3272_p11, %p3449_p5 }
 0x236   : > { %v1110_v22 = vsel %vm1040_vm1, %v1108_v19, %v1109_v20 }
 0x237   : > { %v3081_v23 = vpack.i.bf16 %v1109_v20, %v1110_v22  ;;  %p3274_p13 = pneg %p3273_p12 }
 0x239   : > { %3082 = vrot.lane.b32.xlu0 %v3081_v23, %s3337_s17 }
 0x26f   : > { %v3033_v25 = vpop.permute.xlu0 %3032 }
 0x270   : > { %v3035_v30 = vunpack.i.h.bf16 %v3033_v25  ;;  %v3034_v31 = vunpack.i.l.bf16 %v3033_v25 }
 0x272   : > { %v1119_v44 = vsel %vm1117_vm2, %v3603_v32, %v3035_v30  ;;  %v1118_v45 = vsel %vm1117_vm2, %v3595_v28, %v3034_v31  ;;  %v2605_v31 = vld [vmem:[%s4091_s5] ss:$0 sm:$0xff] }
 0x273   : > { %v3038_v27 = vpop.permute.xlu1 %3037 }
 0x274   : > { %v3040_v33 = vunpack.i.h.bf16 %v3038_v27  ;;  %v3039_v35 = vunpack.i.l.bf16 %v3038_v27 }
 0x276   : > { %v1121_v46 = vsel %vm843_vm9, %v1119_v44, %v3040_v33  ;;  %v1120_v47 = vsel %vm843_vm9, %v1118_v45, %v3039_v35 }
 0x277   : > { %v3043_v26 = vpop.permute.xlu0 %3042 }
 0x278   : > { %v3045_v40 = vunpack.i.h.bf16 %v3043_v26  ;;  %v3044_v41 = vunpack.i.l.bf16 %v3043_v26 }
 0x27a   : > { %v1124_v32 = vsel %vm1122_vm3, %v1121_v46, %v3045_v40  ;;  %v1123_v53 = vsel %vm1122_vm3, %v1120_v47, %v3044_v41 }
 0x27b   : > { %v1143_v59 = vpack.c.bf16 %v1124_v32, %v1123_v53 }
 0x27f   : > { %v3048_v29 = vpop.permute.xlu0 %3047 }
 0x280   : > { %v3050_v38 = vunpack.i.h.bf16 %v3048_v29  ;;  %v3049_v39 = vunpack.i.l.bf16 %v3048_v29 }
 0x282   : > { %v1126_v49 = vsel %vm1117_vm2, %v1013_v2, %v3050_v38  ;;  %v1125_v50 = vsel %vm1117_vm2, %v3660_v6, %v3049_v39 }
 0x283   : > { %v3053_v37 = vpop.permute.xlu1 %3052 }
 0x284   : > { %v3055_v42 = vunpack.i.h.bf16 %v3053_v37  ;;  %v3054_v43 = vunpack.i.l.bf16 %v3053_v37 }
 0x286   : > { %v1128_v28 = vsel %vm843_vm9, %v1126_v49, %v3055_v42  ;;  %v1127_v54 = vsel %vm843_vm9, %v1125_v50, %v3054_v43 }
 0x287   : > { %v3058_v48 = vpop.permute.xlu0 %3057 }
 0x288   : > { %v3060_v51 = vunpack.i.h.bf16 %v3058_v48  ;;  %v3059_v52 = vunpack.i.l.bf16 %v3058_v48  ;;  %v3338_v48 = vmov 65535  }
 0x289   : > { %v1518_v49 = vsel %vm1011_vm13, 4294967295, %v3338_v48 }
 0x28a   : > { %v1129_v55 = vsel %vm1122_vm3, %v1127_v54, %v3059_v52  ;;  %v1130_v57 = vsel %vm1122_vm3, %v1128_v28, %v3060_v51  ;;  %v1519_v32 = vsel %vm1000_vm12, %v1518_v49, 0  ;;  %v3170_v54 = vld [vmem:[%s4092_s6] sm:$0x1f]  }
 0x28b   : > { %v1144_v0 = vpack.c.bf16 %v1130_v57, %v1129_v55  ;;  %v3171_v55 = vld [vmem:[%s4093_s7 + $0x78] sm:$0xff]  }
 0x28c   : > { %v3172_v57 = vld [vmem:[%s4093_s7 + $0x38] sm:$0xff]  }
 0x28d   : > { %1377 = vmatprep.mubr.bf16.mxu0 %v1144_v0  ;;  %v3173_v0 = vld [vmem:[%s4093_s7 + $0xf8] sm:$0xff]  }
 0x28e   : > { %1378 = vmatmul.mubr.bf16.vlgmr.msra.gmra.mxu0 %v1143_v59  ;;  %v3174_v59 = vld [vmem:[%s4093_s7 + $0xb8] sm:$0xff]   ;;  %2852 = vmatprep.subr.bf16.mxu1 %v3173_v0  ;;  %v3209_v0 = vld [vmem:[%s4095_s9 + $0x64] ss:$16 sps:$4 sm:$0xff]  }
 0x28f   : > { %2969 = vmatprep.mubr.msk.bf16.mxu0 %vm3334_vm0, %v3333_v24 }
 0x293   : > { %v3063_v2 = vpop.permute.xlu1 %3062 }
 0x294   : > { %v3065_v62 = vunpack.i.h.bf16 %v3063_v2  ;;  %v3064_v63 = vunpack.i.l.bf16 %v3063_v2  ;;  %v3175_v2 = vld [vmem:[%s4093_s7 + $0x70] sm:$0xff]  }
 0x296   : > { %v1132_v13 = vsel %vm1117_vm2, %v3690_v36, %v3065_v62  ;;  %v1131_v14 = vsel %vm1117_vm2, %v3687_v34, %v3064_v63  ;;  %v3178_v62 = vld [vmem:[%s4093_s7 + $0xb0] sm:$0xff]   ;;  %v3179_v63 = vld [vmem:[%s4093_s7 + $0x68] sm:$0xff]  }
 0x297   : > { %v3068_v6 = vpop.permute.xlu1 %3067 }
 0x298   : > { %v3070_v1 = vunpack.i.h.bf16 %v3068_v6  ;;  %v3069_v3 = vunpack.i.l.bf16 %v3068_v6  ;;  %v3177_v6 = vld [vmem:[%s4093_s7 + $0xf0] sm:$0xff]  }
 0x29a   : > { %v1134_v15 = vsel %vm843_vm9, %v1132_v13, %v3070_v1  ;;  %v1133_v16 = vsel %vm843_vm9, %v1131_v14, %v3069_v3  ;;  %v3181_v1 = vld [vmem:[%s4093_s7 + $0xe8] sm:$0xff]   ;;  %v3190_v13 = vld [vmem:[%s4093_s7 + $0x98] sm:$0xff]   ;;  %v3191_v14 = vld [vmem:[%s4093_s7 + $0x50] sm:$0xff]  }
 0x29b   : > { %v3180_v3 = vld [vmem:[%s4093_s7 + $0x28] sm:$0xff]  }
 0x2a3   : > { %v3073_v61 = vpop.permute.xlu1 %3072 }
 0x2a4   : > { %v3075_v7 = vunpack.i.h.bf16 %v3073_v61  ;;  %v3074_v8 = vunpack.i.l.bf16 %v3073_v61  ;;  %v3176_v61 = vld [vmem:[%s4093_s7 + $0x30] sm:$0xff]  }
 0x2a6   : > { %v1138_v18 = vsel %vm1117_vm2, %v1083_v58, %v3075_v7  ;;  %v1137_v19 = vsel %vm1117_vm2, %v3715_v60, %v3074_v8  ;;  %v3185_v7 = vld [vmem:[%s4093_s7 + $0xe0] sm:$0xff]  }
 0x2a7   : > { %v3088_v4 = vpop.permute.xlu1 %3087  ;;  %v3078_v5 = vpop.permute.xlu0 %3077  ;;  %v3184_v8 = vld [vmem:[%s4093_s7 + $0x20] sm:$0xff]  }
 0x2a8   : > { %v3090_v9 = vunpack.i.h.bf16 %v3088_v4  ;;  %v3089_v10 = vunpack.i.l.bf16 %v3088_v4  ;;  %v3080_v11 = vunpack.i.h.bf16 %v3078_v5  ;;  %v3079_v12 = vunpack.i.l.bf16 %v3078_v5  ;;  %v3182_v4 = vld [vmem:[%s4093_s7 + $0xa8] sm:$0xff]   ;;  %v3183_v5 = vld [vmem:[%s4093_s7 + $0x60] sm:$0xff]  }
 0x2aa   : > { %v1136_v22 = vsel %vm1122_vm3, %v1134_v15, %v3090_v9  ;;  %v1135_v36 = vsel %vm1122_vm3, %v1133_v16, %v3089_v10  ;;  %v1140_v34 = vsel %vm843_vm9, %v1138_v18, %v3080_v11  ;;  %v1139_v23 = vsel %vm843_vm9, %v1137_v19, %v3079_v12  ;;  %v3186_v9 = vld [vmem:[%s4093_s7 + $0xa0] sm:$0xff]   ;;  %v3187_v10 = vld [vmem:[%s4093_s7 + $0x58] sm:$0xff]   ;;  %v3193_v15 = vld [vmem:[%s4093_s7 + $0xd0] sm:$0xff]  }
 0x2ab   : > { %v3083_v17 = vpop.permute.xlu0 %3082  ;;  %v1145_v27 = vpack.c.bf16 %v1136_v22, %v1135_v36  ;;  %v3189_v11 = vld [vmem:[%s4093_s7 + $0xd8] sm:$0xff]   ;;  %v3192_v16 = vld [vmem:[%s4093_s7 + $0x10] sm:$0xff]   ;;  %v3195_v18 = vld [vmem:[%s4093_s7 + $0x48] sm:$0xff]  }
 0x2ac   : > { %v3085_v20 = vunpack.i.h.bf16 %v3083_v17  ;;  %v3084_v21 = vunpack.i.l.bf16 %v3083_v17  ;;  %v3188_v12 = vld [vmem:[%s4093_s7 + $0x18] sm:$0xff]   ;;  %v3194_v17 = vld [vmem:[%s4093_s7 + $0x90] sm:$0xff]   ;;  %v3197_v19 = vld [vmem:[%s4093_s7 + $0xc8] sm:$0xff]  }
 0x2ad   : > { %v3199_v22 = vld [vmem:[%s4093_s7 + $0x40] sm:$0xff]  }
 0x2ae   : > { %v1141_v25 = vsel %vm1122_vm3, %v1139_v23, %v3084_v21  ;;  %v1142_v26 = vsel %vm1122_vm3, %v1140_v34, %v3085_v20  ;;  %v3196_v20 = vld [vmem:[%s4093_s7 + $0x8] sm:$0xff]   ;;  %v3200_v36 = vld [vmem:[%s4093_s7] sm:$0xff]  }
 0x2af   : > { %v1146_v56 = vpack.c.bf16 %v1142_v26, %v1141_v25  ;;  %v3198_v21 = vld [vmem:[%s4093_s7 + $0x88] sm:$0xff]   ;;  %v3201_v34 = vld [vmem:[%s4093_s7 + $0xc0] sm:$0xff]  }
 0x2b0   : > { %v3202_v23 = vld [vmem:[%s4093_s7 + $0x80] sm:$0xff]  }
 0x2b1   : > { %1418 = vmatprep.mubr.bf16.mxu1 %v1146_v56 }
 0x2b2   : > { %1419 = vmatmul.mubr.bf16.vlgmr.msra.gmra.mxu1 %v1145_v27 }
 0x2b3   : > { %2853 = vmatpush3.bf16.msra.mxu1 %v3174_v59  ;;  %v3210_v59 = vld [vmem:[%s4095_s9 + $0x68] ss:$16 sps:$4 sm:$0xff]  }
 0x2b4   : > { %2854 = vmatprep.subr.bf16.mxu1 %v3177_v6  ;;  %v3218_v6 = vld [vmem:[%s4095_s9 + $0x4c] ss:$16 sps:$4 sm:$0xff]  }
 0x2b7   : > { %2855 = vmatpush3.bf16.msra.mxu1 %v3178_v62  ;;  %v3216_v62 = vld [vmem:[%s4095_s9 + $0x48] ss:$16 sps:$4 sm:$0xff]  }
 0x2b8   : > { %2856 = vmatprep.subr.bf16.mxu1 %v3181_v1  ;;  %v3224_v1 = vld [vmem:[%s4095_s9 + $0x2c] ss:$16 sps:$4 sm:$0xff]  }
 0x2bb   : > { %2857 = vmatpush3.bf16.msra.mxu1 %v3182_v4  ;;  %v3222_v4 = vld [vmem:[%s4095_s9 + $0x28] ss:$16 sps:$4 sm:$0xff]  }
 0x2bc   : > { %2858 = vmatprep.subr.bf16.mxu1 %v3185_v7  ;;  %v3230_v7 = vld [vmem:[%s4095_s9 + $0xc] ss:$16 sps:$4 sm:$0xff]  }
 0x2bf   : > { %2859 = vmatpush3.bf16.msra.mxu1 %v3186_v9  ;;  %v3228_v9 = vld [vmem:[%s4095_s9 + $0x8] ss:$16 sps:$4 sm:$0xff]  }
 0x2c0   : > { %2860 = vmatprep.subr.bf16.mxu1 %v3189_v11  ;;  %v3231_v11 = vld [vmem:[%s4097_s11 + $0x78] sm:$0xff]  }
 0x2c3   : > { %2861 = vmatpush3.bf16.msra.mxu1 %v3190_v13 }
 0x2c4   : > { %2862 = vmatprep.subr.bf16.mxu1 %v3193_v15 }
 0x2c7   : > { %2863 = vmatpush3.bf16.msra.mxu1 %v3194_v17 }
 0x2c8   : > { %2864 = vmatprep.subr.bf16.mxu1 %v3197_v19 }
 0x2cb   : > { %2865 = vmatpush3.bf16.msra.mxu1 %v3198_v21 }
 0x2cc   : > { %2866 = vmatprep.subr.bf16.mxu1 %v3201_v34 }
 0x2cf   : > { %2867 = vmatpush3.bf16.msra.mxu1 %v3202_v23 }
 0x34e   : > { %v2800_v58 = vpop.f32.mrf.mxu0 }
 0x350   : > { %v2801_v60 = vpop.f32.mrf.mxu0 }
 0x351   : > { %v2802_v30 = vadd.f32 %v2801_v60, %v2800_v58 }
 0x352   : > { %v2803_v29 = vpop.f32.mrf.mxu0 }
 0x353   : > { %v1380_v38 = vadd.f32 %v2802_v30, %v2605_v31 }
 0x354   : > { %v2804_v33 = vpop.f32.mrf.mxu0 }
 0x355   : > { %v2805_v39 = vadd.f32 %v2804_v33, %v2803_v29 }
 0x357   : > { %v1383_v44 = vadd.f32 %v2805_v39, %v2605_v31 }
 0x372   : > { %v2822_v35 = vpop.f32.mrf.mxu1 }
 0x374   : > { %v2823_v37 = vpop.f32.mrf.mxu1 }
 0x375   : > { %v2824_v40 = vadd.f32 %v2823_v37, %v2822_v35 }
 0x376   : > { %v2825_v41 = vpop.f32.mrf.mxu1 }
 0x377   : > { %v1421_v42 = vadd.f32 %v2824_v40, %v1380_v38 }
 0x378   : > { %v2826_v43 = vpop.f32.mrf.mxu1 }
 0x379   : > { %v2827_v45 = vadd.f32 %v2826_v43, %v2825_v41  ;;  %v1429_v46 = vmul.f32 0.01, %v1421_v42  ;;  %vm1427_vm4 = vcmp.ge.f32.partialorder %v1421_v42, 0.0 }
 0x37b   : > { %v1424_v47 = vadd.f32 %v2827_v45, %v1383_v44  ;;  %v1431_v51 = vsel %vm1427_vm4, %v1421_v42, %v1429_v46 }
 0x37d   : > { %vm1428_vm5 = vcmp.ge.f32.partialorder %v1424_v47, 0.0  ;;  %v1430_v50 = vmul.f32 0.01, %v1424_v47 }
 0x37f   : > { %v1432_v52 = vsel %vm1428_vm5, %v1424_v47, %v1430_v50 }
 0x380   : > { %v1508_v53 = vpack.c.bf16 %v1432_v52, %v1431_v51 }
 0x382   : > { %v1521_v28 = vand.u32 %v1519_v32, %v1508_v53  ;;  %v3203_v32 = vld [vmem:[%s4093_s7 + $0x118] sm:$0xff]   ;;  %v3204_v53 = vld [vmem:[%s4093_s7 + $0x110] sm:$0xff]  }
 0x384   : > { %2968 = vmatpush3.bf16.msra.mxu0 %v1521_v28  ;;  %v3205_v28 = vld [vmem:[%s4093_s7 + $0x108] sm:$0xff]  }
 0x385   : > { %2830 = vmatprep.subr.bf16.mxu0 %v3171_v55 }
 0x387   : > { %2970 = vmatmul.mubr.msk.bf16.vlgmr.msra.gmra.mxu0 %vm1514_vm6, %v3170_v54  ;;  %v3206_v54 = vld [vmem:[%s4093_s7 + $0x100] sm:$0xff]  }
 0x388   : > { %2831 = vmatpush3.bf16.msra.mxu0 %v3172_v57  ;;  %v3207_v57 = vld [vmem:[%s4095_s9 + $0x60] ss:$16 sps:$4 sm:$0xff]  }
 0x389   : > { %2832 = vmatprep.subr.bf16.mxu0 %v3175_v2  ;;  %v3215_v2 = vld [vmem:[%s4095_s9 + $0x44] ss:$16 sps:$4 sm:$0xff]  }
 0x38c   : > { %2833 = vmatpush3.bf16.msra.mxu0 %v3176_v61  ;;  %v3213_v61 = vld [vmem:[%s4095_s9 + $0x40] ss:$16 sps:$4 sm:$0xff]  }
 0x38d   : > { %2834 = vmatprep.subr.bf16.mxu0 %v3179_v63  ;;  %v3221_v63 = vld [vmem:[%s4095_s9 + $0x24] ss:$16 sps:$4 sm:$0xff]  }
 0x390   : > { %2835 = vmatpush3.bf16.msra.mxu0 %v3180_v3  ;;  %v3219_v3 = vld [vmem:[%s4095_s9 + $0x20] ss:$16 sps:$4 sm:$0xff]  }
 0x391   : > { %2836 = vmatprep.subr.bf16.mxu0 %v3183_v5  ;;  %v3227_v5 = vld [vmem:[%s4095_s9 + $0x4] ss:$16 sps:$4 sm:$0xff]  }
 0x394   : > { %2837 = vmatpush3.bf16.msra.mxu0 %v3184_v8  ;;  %v3225_v8 = vld [vmem:[%s4095_s9] ss:$16 sps:$4 sm:$0xff]  }
 0x395   : > { %2838 = vmatprep.subr.bf16.mxu0 %v3187_v10  ;;  %v3339_v10 = vmov 0  }
 0x398   : > { %2839 = vmatpush3.bf16.msra.mxu0 %v3188_v12  ;;  %v3232_v12 = vld [vmem:[%s4097_s11 + $0xf8] sm:$0xff]  }
 0x399   : > { %2840 = vmatprep.subr.bf16.mxu0 %v3191_v14 }
 0x39c   : > { %2841 = vmatpush3.bf16.msra.mxu0 %v3192_v16 }
 0x39d   : > { %2842 = vmatprep.subr.bf16.mxu0 %v3195_v18 }
 0x3a0   : > { %2843 = vmatpush3.bf16.msra.mxu0 %v3196_v20 }
 0x3a1   : > { %2844 = vmatprep.subr.bf16.mxu0 %v3199_v22  ;;  %v1507_v22 = vld [vmem:[%s4094_s8] sm:$0x1] }
 0x3a4   : > { %2845 = vmatpush3.bf16.msra.mxu0 %v3200_v36 }
 0x3a5   : > { %2973 = vmatprep.subr.bf16.mxu0 %v3333_v24 }
 0x447   : > { %v1557_v25 = vpop.f32.mrf.mxu0 }
 0x448   : > { %v1577_v26 = vrot.slane %v1557_v25, 5  ;;  %v1583_v56 = vrot.slane %v1557_v25, 7  ;;  %v1565_v27 = vrot.slane %v1557_v25, 1  ;;  %v1571_v58 = vrot.slane %v1557_v25, 3 }
 0x449   : > { %v2971_v60 = vpop.f32.mrf.mxu0  ;;  %v1575_v37 = vrot.slane %v1557_v25, 4  ;;  %v1569_v39 = vrot.slane %v1557_v25, 2  ;;  %v1581_v40 = vrot.slane %v1557_v25, 6 }
 0x44a   : > { %v3096_v29 = vpack.i.bf16 %v1577_v26, %v1583_v56  ;;  %v3091_v30 = vpack.i.bf16 %v1565_v27, %v1571_v58 }
 0x44b   : > { %v1560_v31 = vpop.f32.mrf.mxu0 }
 0x44c   : > { %3097 = vrot.lane.b32.xlu1 %v3096_v29, %s3336_s24  ;;  %3092 = vrot.lane.b32.xlu0 %v3091_v30, %s3336_s24  ;;  %v1595_v55 = vpack.c.bf16 %v1560_v31, %v1560_v31  ;;  %v3233_v29 = vld [vmem:[%s4097_s11 + $0x38] sm:$0xff]   ;;  %s3277_s24 = scalar_lea.vmem %s3276_s21, 32 }
 0x44d   : > { %v2972_v33 = vpop.f32.mrf.mxu0  ;;  %v3234_v30 = vld [vmem:[%s4097_s11 + $0xb8] sm:$0xff]   ;;  %p3279_p1 = scmp.lt.s32.totalorder %s3277_s24, %s3271_s20 }
 0x44f   : > { %p3280_p2 = por %p3279_p1, %p3278_p0 }
 0x451   : > { %p3281_p3 = pnand %p3280_p2, %p3274_p13 }
 0x4be   : > { %v3098_v35 = vpop.permute.xlu1 %3097  ;;  %v3093_v38 = vpop.permute.xlu0 %3092 }
 0x4bf   : > { %v3100_v41 = vunpack.i.h.bf16 %v3098_v35  ;;  %v3099_v42 = vunpack.i.l.bf16 %v3098_v35  ;;  %v3095_v43 = vunpack.i.h.bf16 %v3093_v38  ;;  %v3094_v44 = vunpack.i.l.bf16 %v3093_v38  ;;  %v3235_v35 = vld [vmem:[%s4097_s11 + $0x70] sm:$0xff]  }
 0x4c0   : > { %v3237_v38 = vld [vmem:[%s4097_s11 + $0x30] sm:$0xff]  }
 0x4c1   : > { %v1589_v45 = vsel %vm843_vm9, %v1575_v37, %v3100_v41  ;;  %v1587_v46 = vsel %vm843_vm9, %v1557_v25, %v3095_v43  ;;  %v1588_v47 = vsel %vm843_vm9, %v1569_v39, %v3094_v44  ;;  %v1590_v48 = vsel %vm843_vm9, %v1581_v40, %v3099_v42  ;;  %v3236_v37 = vld [vmem:[%s4097_s11 + $0xf0] sm:$0xff]   ;;  %v3239_v40 = vld [vmem:[%s4097_s11 + $0x68] sm:$0xff]   ;;  %v3243_v44 = vld [vmem:[%s4097_s11 + $0x60] sm:$0xff]  }
 0x4c2   : > { %v1593_v49 = vpack.c.bf16 %v1589_v45, %v1589_v45  ;;  %v1591_v50 = vpack.c.bf16 %v1587_v46, %v1587_v46  ;;  %v1592_v51 = vpack.c.bf16 %v1588_v47, %v1588_v47  ;;  %v1594_v52 = vpack.c.bf16 %v1590_v48, %v1590_v48  ;;  %v3238_v39 = vld [vmem:[%s4097_s11 + $0xb0] sm:$0xff]   ;;  %v3240_v41 = vld [vmem:[%s4097_s11 + $0xe8] sm:$0xff]   ;;  %v3244_v45 = vld [vmem:[%s4097_s11 + $0xe0] sm:$0xff]  }
 0x4c3   : > { %v3241_v42 = vld [vmem:[%s4097_s11 + $0x28] sm:$0xff]   ;;  %v3245_v46 = vld [vmem:[%s4097_s11 + $0x20] sm:$0xff]   ;;  %v3247_v48 = vld [vmem:[%s4097_s11 + $0x58] sm:$0xff]  }
 0x4c4   : > { %1847 = vmatprep.mubr.bf16.mxu0 %v1592_v51  ;;  %1887 = vmatprep.mubr.bf16.mxu1 %v1594_v52  ;;  %v3242_v43 = vld [vmem:[%s4097_s11 + $0xa8] sm:$0xff]   ;;  %v3246_v47 = vld [vmem:[%s4097_s11 + $0xa0] sm:$0xff]   ;;  %v3250_v51 = vld [vmem:[%s4097_s11 + $0x98] sm:$0xff]  }
 0x4c5   : > { %1848 = vmatmul.mubr.bf16.vlgmr.msra.gmra.mxu0 %v1591_v50  ;;  %1888 = vmatmul.mubr.bf16.vlgmr.msra.gmra.mxu1 %v1593_v49  ;;  %v3248_v49 = vld [vmem:[%s4097_s11 + $0xd8] sm:$0xff]   ;;  %v3251_v52 = vld [vmem:[%s4097_s11 + $0x50] sm:$0xff]  }
 0x4c6   : > { %2974 = vmatpush3.bf16.msra.mxu0 %v3203_v32  ;;  %2981 = vmatprep.mubr.msk.bf16.mxu0 %vm3334_vm0, %v3333_v24  ;;  %v3249_v50 = vld [vmem:[%s4097_s11 + $0x18] sm:$0xff]   ;;  %v3252_v32 = vld [vmem:[%s4097_s11 + $0xd0] sm:$0xff]  }
 0x4c7   : > { %2975 = vmatprep.subr.bf16.mxu0 %v3333_v24  ;;  %2133 = vmatprep.mubr.bf16.mxu1 %v3339_v10 }
 0x4ca   : > { %2976 = vmatpush3.bf16.msra.mxu0 %v3204_v53  ;;  %v3253_v53 = vld [vmem:[%s4097_s11 + $0x10] sm:$0xff]  }
 0x4cb   : > { %2977 = vmatprep.subr.bf16.mxu0 %v3333_v24 }
 0x4ce   : > { %2978 = vmatpush3.bf16.msra.mxu0 %v3205_v28  ;;  %v3254_v28 = vld [vmem:[%s4097_s11 + $0x90] sm:$0xff]  }
 0x4cf   : > { %2979 = vmatprep.subr.bf16.mxu0 %v3333_v24  ;;  %v3212_v24 = vld [vmem:[%s4095_s9 + $0x6c] ss:$16 sps:$4 sm:$0xff]  }
 0x4d0   : > { %2109 = vmatprep.subr.bf16.mxu1 %v3212_v24  ;;  %v3260_v24 = vld [vmem:[%s4097_s11 + $0xc0] sm:$0xff]  }
 0x4d1   : > { %2110 = vmatpush1.bf16.msra.mxu1 %v3210_v59  ;;  %v3259_v59 = vld [vmem:[%s4097_s11 + $0x40] sm:$0xff]  }
 0x4d2   : > { %2980 = vmatpush3.bf16.msra.mxu0 %v3206_v54  ;;  %2111 = vmatprep.subr.bf16.mxu1 %v3218_v6  ;;  %v3255_v54 = vld [vmem:[%s4097_s11 + $0x48] sm:$0xff]   ;;  %v3262_v6 = vld [vmem:[%s4097_s11 + $0x80] sm:$0xff]  }
 0x4d3   : > { %2068 = vmatprep.subr.bf16.mxu0 %v3209_v0  ;;  %v3258_v0 = vld [vmem:[%s4097_s11 + $0x88] sm:$0xff]  }
 0x4d5   : > { %2982 = vmatmul.mubr.msk.bf16.vlgmr.msra.gmra.mxu0 %vm843_vm9, %v1595_v55  ;;  %2112 = vmatpush1.bf16.msra.mxu1 %v3216_v62  ;;  %v3256_v55 = vld [vmem:[%s4097_s11 + $0xc8] sm:$0xff]  }
 0x4d6   : > { %2069 = vmatpush1.bf16.msra.mxu0 %v3207_v57  ;;  %2113 = vmatprep.subr.bf16.mxu1 %v3224_v1  ;;  %v3257_v57 = vld [vmem:[%s4097_s11 + $0x8] sm:$0xff]  }
 0x4d7   : > { %2070 = vmatprep.subr.bf16.mxu0 %v3215_v2  ;;  %2092 = vmatprep.mubr.bf16.mxu0 %v3339_v10  ;;  %v3261_v2 = vld [vmem:[%s4097_s11] sm:$0xff]  }
 0x4d9   : > { %2114 = vmatpush1.bf16.msra.mxu1 %v3222_v4 }
 0x4da   : > { %2071 = vmatpush1.bf16.msra.mxu0 %v3213_v61  ;;  %2115 = vmatprep.subr.bf16.mxu1 %v3230_v7  ;;  %v2037_v61 = vlaneseq }
 0x4db   : > { %2072 = vmatprep.subr.bf16.mxu0 %v3221_v63 }
 0x4dc   : > { %v2038_v62 = vshrl.u32 %v2037_v61, 7 }
 0x4dd   : > { %2116 = vmatpush1.bf16.msra.mxu1 %v3228_v9 }
 0x4de   : > { %2073 = vmatpush1.bf16.msra.mxu0 %v3219_v3  ;;  %2901 = vmatprep.subr.bf16.mxu1 %v3232_v12  ;;  %v2039_v63 = vsub.s32 0, %v2038_v62  ;;  %v2047_v1 = vsub.s32 2, %v2038_v62  ;;  %v1955_v3 = vld [vmem:[%s4096_s10] sm:$0xf]  ;;  %v2043_v4 = vsub.s32 1, %v2038_v62 }
 0x4df   : > { %2074 = vmatprep.subr.bf16.mxu0 %v3227_v5  ;;  %v2051_v5 = vsub.s32 3, %v2038_v62 }
 0x4e0   : > { %v2040_v7 = vrot.slane %v1955_v3, %v2039_v63  ;;  %v2044_v9 = vrot.slane %v1955_v3, %v2043_v4 }
 0x4e1   : > { %v2052_v10 = vrot.slane %v1955_v3, %v2051_v5 }
 0x4e2   : > { %2075 = vmatpush1.bf16.msra.mxu0 %v3225_v8  ;;  %v2048_v8 = vrot.slane %v1955_v3, %v2047_v1 }
 0x4e3   : > { %2879 = vmatprep.subr.bf16.mxu0 %v3231_v11 }
 0x585   : > { %v2846_v13 = vpop.f32.mrf.mxu0  ;;  %v2868_v14 = vpop.f32.mrf.mxu1 }
 0x587   : > { %v2847_v15 = vpop.f32.mrf.mxu0  ;;  %v2869_v16 = vpop.f32.mrf.mxu1 }
 0x588   : > { %v2848_v21 = vadd.f32 %v2847_v15, %v2846_v13  ;;  %v2870_v34 = vadd.f32 %v2869_v16, %v2868_v14 }
 0x589   : > { %v2849_v17 = vpop.f32.mrf.mxu0  ;;  %v2871_v18 = vpop.f32.mrf.mxu1 }
 0x58a   : > { %v1850_v36 = vadd.f32 %v2848_v21, %v1507_v22 }
 0x58b   : > { %v2850_v19 = vpop.f32.mrf.mxu0  ;;  %v2872_v20 = vpop.f32.mrf.mxu1 }
 0x58c   : > { %v1890_v23 = vadd.f32 %v2870_v34, %v1850_v36 }
 0x595   : > { %v1929_v25 = vpop.f32.mrf.mxu0 }
 0x596   : > { %v1930_v26 = vadd.f32 %v1929_v25, %v1890_v23 }
 0x597   : > { %v2983_v56 = vpop.f32.mrf.mxu0 }
 0x598   : > { %vm1935_vm0 = vcmp.ge.f32.partialorder %v1930_v26, 0.0  ;;  %v1936_v27 = vmul.f32 0.01, %v1930_v26 }
 0x599   : > { %v1932_v58 = vpop.f32.mrf.mxu0 }
 0x59a   : > { %v1937_v60 = vsel %vm1935_vm0, %v1930_v26, %v1936_v27 }
 0x59b   : > { %v1938_v31 = vpack.c.bf16 %v1937_v60, %v1937_v60  ;;  %v2984_v33 = vpop.f32.mrf.mxu0 }
 0x59d   : > { %2693 = vmatmul.mubr.msk.bf16.vlgmr.msra.gmra.mxu0 %vm843_vm9, %v1938_v31  ;;  %2694 = vmatmul.mubr.msk.bf16.vlgmr.msra.gmra.mxu1 %vm843_vm9, %v1938_v31 }
 0x59e   : > { %2880 = vmatpush3.bf16.msra.mxu0 %v3233_v29  ;;  %2902 = vmatpush3.bf16.msra.mxu1 %v3234_v30  ;;  %v2214_v30 = vld [vmem:[%s4098_s12] sm:$0x1] }
 0x59f   : > { %2881 = vmatprep.subr.bf16.mxu0 %v3235_v35  ;;  %2903 = vmatprep.subr.bf16.mxu1 %v3236_v37 }
 0x5a2   : > { %2882 = vmatpush3.bf16.msra.mxu0 %v3237_v38  ;;  %2904 = vmatpush3.bf16.msra.mxu1 %v3238_v39 }
 0x5a3   : > { %2883 = vmatprep.subr.bf16.mxu0 %v3239_v40  ;;  %2905 = vmatprep.subr.bf16.mxu1 %v3240_v41 }
 0x5a6   : > { %2884 = vmatpush3.bf16.msra.mxu0 %v3241_v42  ;;  %2906 = vmatpush3.bf16.msra.mxu1 %v3242_v43 }
 0x5a7   : > { %2885 = vmatprep.subr.bf16.mxu0 %v3243_v44  ;;  %2907 = vmatprep.subr.bf16.mxu1 %v3244_v45 }
 0x5aa   : > { %2886 = vmatpush3.bf16.msra.mxu0 %v3245_v46  ;;  %2908 = vmatpush3.bf16.msra.mxu1 %v3246_v47 }
 0x5ab   : > { %2887 = vmatprep.subr.bf16.mxu0 %v3247_v48  ;;  %2909 = vmatprep.subr.bf16.mxu1 %v3248_v49 }
 0x5ae   : > { %2888 = vmatpush3.bf16.msra.mxu0 %v3249_v50  ;;  %2910 = vmatpush3.bf16.msra.mxu1 %v3250_v51 }
 0x5af   : > { %2889 = vmatprep.subr.bf16.mxu0 %v3251_v52  ;;  %2911 = vmatprep.subr.bf16.mxu1 %v3252_v32 }
 0x5b2   : > { %2890 = vmatpush3.bf16.msra.mxu0 %v3253_v53  ;;  %2912 = vmatpush3.bf16.msra.mxu1 %v3254_v28 }
 0x5b3   : > { %2891 = vmatprep.subr.bf16.mxu0 %v3255_v54  ;;  %2913 = vmatprep.subr.bf16.mxu1 %v3256_v55 }
 0x5b6   : > { %2892 = vmatpush3.bf16.msra.mxu0 %v3257_v57  ;;  %2914 = vmatpush3.bf16.msra.mxu1 %v3258_v0 }
 0x5b7   : > { %2893 = vmatprep.subr.bf16.mxu0 %v3259_v59  ;;  %2915 = vmatprep.subr.bf16.mxu1 %v3260_v24 }
 0x5ba   : > { %2894 = vmatpush3.bf16.msra.mxu0 %v3261_v2  ;;  %2916 = vmatpush3.bf16.msra.mxu1 %v3262_v6 }
 0x65d   : > { %v2094_v11 = vpop.f32.mrf.mxu0  ;;  %v2135_v12 = vpop.f32.mrf.mxu1 }
 0x65e   : > { %v2095_v13 = vadd.f32 %v2094_v11, %v2040_v7  ;;  %v2136_v14 = vadd.f32 %v2135_v12, %v2048_v8 }
 0x65f   : > { %v2096_v15 = vpop.f32.mrf.mxu0  ;;  %v2137_v16 = vpop.f32.mrf.mxu1 }
 0x660   : > { %3263 = vtanh.f32 %v2095_v13  ;;  %v2097_v17 = vadd.f32 %v2096_v15, %v2044_v9  ;;  %v2138_v18 = vadd.f32 %v2137_v16, %v2052_v10 }
 0x661   : > { %3265 = vtanh.f32 %v2136_v14  ;;  %v2098_v19 = vpop.f32.mrf.mxu0  ;;  %v2139_v20 = vpop.f32.mrf.mxu1 }
 0x662   : > { %3267 = vtanh.f32 %v2097_v17 }
 0x663   : > { %3269 = vtanh.f32 %v2138_v18  ;;  %v2099_v21 = vpop.f32.mrf.mxu0  ;;  %v2140_v22 = vpop.f32.mrf.mxu1 }
 0x66d   : > { %v3264_v36 = vpop.eup %3263 }
 0x66e   : > { %v3266_v34 = vpop.eup %3265  ;;  %v2146_v56 = vpack.c.bf16 %v3264_v36, %v3264_v36 }
 0x66f   : > { %v3268_v23 = vpop.eup %3267  ;;  %v2148_v58 = vpack.c.bf16 %v3266_v34, %v3266_v34 }
 0x670   : > { %v3270_v25 = vpop.eup %3269  ;;  %v2147_v26 = vpack.c.bf16 %v3268_v23, %v3268_v23 }
 0x671   : > { %v2149_v27 = vpack.c.bf16 %v3270_v25, %v3270_v25 }
 0x672   : > { %2439 = vmatprep.mubr.bf16.mxu0 %v2147_v26 }
 0x673   : > { %2479 = vmatprep.mubr.bf16.mxu1 %v2149_v27  ;;  %2440 = vmatmul.mubr.bf16.vlgmr.msra.gmra.mxu0 %v2146_v56 }
 0x674   : > { %2480 = vmatmul.mubr.bf16.vlgmr.msra.gmra.mxu1 %v2148_v58 }
 0x733   : > { %v2895_v60 = vpop.f32.mrf.mxu0 }
 0x734   : > { %v2917_v29 = vpop.f32.mrf.mxu1 }
 0x735   : > { %v2896_v31 = vpop.f32.mrf.mxu0 }
 0x736   : > { %v2897_v33 = vadd.f32 %v2896_v31, %v2895_v60  ;;  %v2918_v35 = vpop.f32.mrf.mxu1 }
 0x737   : > { %v2898_v37 = vpop.f32.mrf.mxu0  ;;  %v2919_v39 = vadd.f32 %v2918_v35, %v2917_v29 }
 0x738   : > { %v2442_v38 = vadd.f32 %v2897_v33, %v2214_v30  ;;  %v2920_v40 = vpop.f32.mrf.mxu1 }
 0x739   : > { %v2899_v41 = vpop.f32.mrf.mxu0 }
 0x73a   : > { %v2482_v42 = vadd.f32 %v2919_v39, %v2442_v38  ;;  %v2921_v43 = vpop.f32.mrf.mxu1 }
 0x73c   : > { %2487 = vst [vmem:[%s432_s15] sm:$0x1] %v2482_v42 }
 0x73d   : > { %3284 = shalt.err (!%p3281_p3)
}
 0x73e   : > { %s3285_s0 = scalar_lea.hbm %s2499_s22, 16  ;;  %s3289_s15 = scalar_lea.hbm %s4099_s13, 32 }
 0x73f   : > { %p3286_p4 = scmp.ne.s32.totalorder %s2499_s22, %s3285_s0  ;;  %p3290_p9 = scmp.lt.s32.totalorder %s2499_s22, %s4099_s13 }
 0x740   : > { %p3291_p10 = scmp.lt.s32.totalorder %s3289_s15, %s3285_s0 }
 0x741   : > { %p3287_p7 = pnand %p3286_p4, %p3449_p5 }
 0x742   : > { %p3292_p11 = por %p3291_p10, %p3290_p9 }
 0x743   : > { %p3288_p8 = pneg %p3287_p7 }
 0x745   : > { %p3293_p12 = pnand %p3292_p11, %p3288_p8 }
 0x747   : > { %3296 = shalt.err (!%p3293_p12)
}
 0x748   : > { %2985 = dma.vmem_to_hbm [thread:$0]  (%p3449_p5), %s2502_s14, 16, %s2499_s22, %s2489_s16  }
 0x749 PF: > { %p2991_p13 = scmp.ge.s32.totalorder %s3331_s28, 2  ;;  %s2513_s20 = sand.u32 1, %s3319_s25  }
 0x74a   : > { %s2514_s29 = scalar_lea.sflag [#allocation3], %s2513_s20 }
 0x74b   : > { %p2988_p0 = pnand %p2991_p13, %p3453_p6 }
 0x74d   : > { %p2989_p1 = pneg %p2988_p0 }
 0x74f   : > { %3314 = dma.done.wait (%p2989_p1), %s2514_s29, 16  }
 0x750   : > { %3316 = vsyncadd (%p2989_p1), %s2514_s29, 4294967280  ;;  %s4110_s28 = sld [smem:[#allocation6_spill]]  ;;  %s4113_s25 = smov %s3323_s26 }
 0x751   : > { %s4111_s0 = sld [smem:[#allocation5_spill]] }
 0x752   : > { %s4112_s27 = sld [smem:[#allocation7_spill]] }
 0x756   : > { %p23_p2 = scmp.ge.s32.totalorder %s4110_s28, 4  }
 0x757   : > { %s4114_s26 = smov %s4111_s0 }
 0x758   :  { %25 = sbr.rel (!%p23_p2) target bundleno = 5 (0x5), region = 107 }
 0x75d   :  { %2518 = vsyncpa [#allocation3], 1 }
 0x75e   :  { %2520 = vsyncpa [#allocation3 + $0x1], 1 }

</bundles_post_ra>
